<compile_context>
chip_gen: v7x
topology: tpu7x:2x2x1
jax: 0.10.0
libtpu: 0.0.40
codegen_flags: <defaults>
</compile_context>

<pallas_src>
import functools

import jax
import jax.numpy as jnp
from jax.experimental import pallas as pl
from jax.experimental.pallas import tpu as pltpu


def _round_up(x, m):
    return ((x + m - 1) // m) * m


# ---------------------------------------------------------------------------
# Fused encoder-layer Pallas kernel
# ---------------------------------------------------------------------------

def _encoder_layer_kernel(
    x_ref, mask_ref,
    wqkv_ref, wo_ref, w1_ref, w2_ref, vecs_ref,
    out_ref, attn_ref,
    *, n_heads, d_model, d_ff, eps,
):
    D, F, H = d_model, d_ff, n_heads
    Dh = D // H
    scale = 1.0 / float(Dh) ** 0.5

    x = x_ref[0]          # (S, D) fp32, layer input == residual
    mask = mask_ref[0]    # (S, S) fp32, 1 = attend / 0 = masked

    # Packed bias / LN vectors (single DMA'd (8, Lpad) block).
    vecs = vecs_ref[...]
    bqkv = vecs[0:1, :3 * D]
    bo   = vecs[1:2, :D]
    g1   = vecs[2:3, :D]
    be1  = vecs[3:4, :D]
    b1   = vecs[4:5, :F]
    b2   = vecs[5:6, :D]
    g2   = vecs[6:7, :D]
    be2  = vecs[7:8, :D]

    # ---- fused QKV projection: one (S,D)x(D,3D) bf16 MXU pass, fp32 accum ----
    x_bf = x.astype(jnp.bfloat16)
    qkv = jnp.dot(x_bf, wqkv_ref[...], preferred_element_type=jnp.float32) + bqkv

    # ---- head-batched attention: (H, S, Dh) layout, batched einsums ----
    qh = jnp.stack([qkv[:,          h * Dh:          (h + 1) * Dh] for h in range(H)],
                   axis=0).astype(jnp.bfloat16)
    kh = jnp.stack([qkv[:, D +      h * Dh: D +      (h + 1) * Dh] for h in range(H)],
                   axis=0).astype(jnp.bfloat16)
    vh = jnp.stack([qkv[:, 2 * D +  h * Dh: 2 * D +  (h + 1) * Dh] for h in range(H)],
                   axis=0).astype(jnp.bfloat16)

    s = jnp.einsum("hqd,hkd->hqk", qh, kh,
                   preferred_element_type=jnp.float32) * scale          # (H,S,S) fp32
    s = jnp.where(mask[None, :, :] > 0.5, s, jnp.float32(-1e9))         # masked_fill

    s_max = jnp.max(s, axis=-1, keepdims=True)
    e = jnp.exp(s - s_max)
    p = e / jnp.sum(e, axis=-1, keepdims=True)                          # exact softmax
    attn_ref[0] = p

    ctx = jnp.einsum("hqk,hkd->hqd", p.astype(jnp.bfloat16), vh,
                     preferred_element_type=jnp.float32)                # (H,S,Dh) fp32
    ctx2 = jnp.concatenate([ctx[h] for h in range(H)], axis=-1)         # (S, D)

    # ---- single full-width O-projection + residual + LayerNorm1 ----
    h1 = x + jnp.dot(ctx2.astype(jnp.bfloat16), wo_ref[...],
                     preferred_element_type=jnp.float32) + bo
    mu1 = jnp.mean(h1, axis=-1, keepdims=True)
    var1 = jnp.mean(h1 * h1, axis=-1, keepdims=True) - mu1 * mu1
    x1 = (h1 - mu1) * jax.lax.rsqrt(var1 + eps) * g1 + be1

    # ---- FFN (ReLU) + residual + LayerNorm2 ----
    f = jnp.dot(x1.astype(jnp.bfloat16), w1_ref[...],
                preferred_element_type=jnp.float32) + b1
    f = jnp.maximum(f, 0.0)
    h2 = jnp.dot(f.astype(jnp.bfloat16), w2_ref[...],
                 preferred_element_type=jnp.float32) + b2 + x1
    mu2 = jnp.mean(h2, axis=-1, keepdims=True)
    var2 = jnp.mean(h2 * h2, axis=-1, keepdims=True) - mu2 * mu2
    out_ref[0] = (h2 - mu2) * jax.lax.rsqrt(var2 + eps) * g2 + be2


def encoder_layer(x, attn_mask, p, n_heads, eps=1e-5):
    """x: (B,S,D) fp32; attn_mask: (B,S,S) fp32 (1=attend, 0=mask). Returns (out, attn)."""
    B, S, D = x.shape
    F = p["w1"].shape[1]
    H = n_heads
    Lpad = p["vecs"].shape[1]

    kernel = functools.partial(_encoder_layer_kernel,
                               n_heads=H, d_model=D, d_ff=F, eps=eps)

    # Explicit scoped-VMEM limit sized from the actual footprint (with headroom):
    # double-buffered activation/mask/output blocks + resident bf16 weights.
    est = (2 * (S * D * 4 + S * S * 4 + S * D * 4 + H * S * S * 4)
           + 2 * (D * 3 * D * 2 + D * D * 2 + D * F * 2 + F * D * 2 + 8 * Lpad * 4)
           + 8 * S * max(3 * D, F, H * S) * 4)
    vmem_limit = int(min(64 * 2 ** 20, max(16 * 2 ** 20, 4 * est)))

    out, attn = pl.pallas_call(
        kernel,
        out_shape=(
            jax.ShapeDtypeStruct((B, S, D), jnp.float32),
            jax.ShapeDtypeStruct((B, H, S, S), jnp.float32),
        ),
        grid=(B,),
        in_specs=[
            pl.BlockSpec((1, S, D), lambda b: (b, 0, 0)),      # x
            pl.BlockSpec((1, S, S), lambda b: (b, 0, 0)),      # 0/1 attention mask
            pl.BlockSpec((D, 3 * D), lambda b: (0, 0)),        # wqkv (bf16, wq|wk|wv)
            pl.BlockSpec((D, D), lambda b: (0, 0)),            # wo (bf16)
            pl.BlockSpec((D, F), lambda b: (0, 0)),            # w1 (bf16)
            pl.BlockSpec((F, D), lambda b: (0, 0)),            # w2 (bf16)
            pl.BlockSpec((8, Lpad), lambda b: (0, 0)),         # packed biases/LN vecs
        ],
        out_specs=(
            pl.BlockSpec((1, S, D), lambda b: (b, 0, 0)),
            pl.BlockSpec((1, H, S, S), lambda b: (b, 0, 0, 0)),
        ),
        compiler_params=pltpu.CompilerParams(
            dimension_semantics=("parallel",),
            vmem_limit_bytes=vmem_limit),
    )(x, attn_mask, p["wqkv"], p["wo"], p["w1"], p["w2"], p["vecs"])
    return out, attn


# ---------------------------------------------------------------------------
# Parameter init (deterministic, synthetic) + JAX glue
# ---------------------------------------------------------------------------

def sinusoidal_position_embedding(max_len, d_model):
    pos = jnp.arange(max_len, dtype=jnp.float32)[:, None]
    i = jnp.arange(d_model, dtype=jnp.float32)[None, :]
    rates = 1.0 / jnp.power(10000.0, (2.0 * jnp.floor(i / 2.0)) / d_model)
    angles = pos * rates
    even = (jnp.arange(d_model)[None, :] % 2) == 0
    return jnp.where(even, jnp.sin(angles), jnp.cos(angles)).astype(jnp.float32)


def _lin_init(key, d_in, d_out):
    w = jax.random.normal(key, (d_in, d_out), jnp.float32) / jnp.sqrt(float(d_in))
    b = jnp.zeros((d_out,), jnp.float32)
    return w, b


def _pack_vectors(d_model, d_ff, bqkv, bo, g1, be1, b1, b2, g2, be2):
    lpad = _round_up(max(3 * d_model, d_ff, d_model), 128)
    vecs = jnp.zeros((8, lpad), jnp.float32)
    for i, r in enumerate([bqkv, bo, g1, be1, b1, b2, g2, be2]):
        vecs = vecs.at[i, :r.shape[0]].set(r)
    return vecs


def init_params(key, vocab_size, max_len, n_heads, d_model, d_ff, n_layers):
    keys = jax.random.split(key, 1 + n_layers)
    params = {
        "token_emb": 0.02 * jax.random.normal(keys[0], (vocab_size, d_model), jnp.float32),
        "pos_emb": sinusoidal_position_embedding(max_len, d_model),
        "layers": [],
    }
    for l in range(n_layers):
        lk = jax.random.split(keys[1 + l], 6)
        wq, bq = _lin_init(lk[0], d_model, d_model)
        wk, bk = _lin_init(lk[1], d_model, d_model)
        wv, bv = _lin_init(lk[2], d_model, d_model)
        wo, bo = _lin_init(lk[3], d_model, d_model)
        w1, b1 = _lin_init(lk[4], d_model, d_ff)
        w2, b2 = _lin_init(lk[5], d_ff, d_model)
        g1 = jnp.ones((d_model,), jnp.float32)
        be1 = jnp.zeros((d_model,), jnp.float32)
        g2 = jnp.ones((d_model,), jnp.float32)
        be2 = jnp.zeros((d_model,), jnp.float32)
        params["layers"].append(dict(
            # bf16 weights for the MXU (fp32 accumulation in-kernel).
            wqkv=jnp.concatenate([wq, wk, wv], axis=1).astype(jnp.bfloat16),
            wo=wo.astype(jnp.bfloat16),
            w1=w1.astype(jnp.bfloat16),
            w2=w2.astype(jnp.bfloat16),
            # all small (1,N) vectors packed into one block.
            vecs=_pack_vectors(d_model, d_ff,
                               jnp.concatenate([bq, bk, bv], axis=0),
                               bo, g1, be1, b1, b2, g2, be2),
        ))
    return params


def encoder_forward(params, tokens, attn_mask, n_heads):
    """tokens: (B,S) int32; attn_mask: (B,S,S) float (1 = attend, 0 = mask)."""
    B, S = tokens.shape
    x = jnp.take(params["token_emb"], tokens, axis=0) + params["pos_emb"][:S][None, :, :]
    # dropout with p=0 -> identity
    attn_mask = attn_mask.astype(jnp.float32)
    attn_list = []
    for p in params["layers"]:
        x, attn = encoder_layer(x, attn_mask, p, n_heads)
        attn_list.append(attn)
    return x, attn_list


# ---------------------------------------------------------------------------
# Demo
# ---------------------------------------------------------------------------

if __name__ == "__main__":
    vocab_size, max_len = 50, 16
    n_heads, d_model, d_ff, n_layers = 4, 32, 64, 2
    B, S = 2, 8

    key = jax.random.PRNGKey(0)
    pkey, tkey = jax.random.split(key)
    params = init_params(pkey, vocab_size, max_len, n_heads, d_model, d_ff, n_layers)

    tokens = jax.random.randint(tkey, (B, S), 0, vocab_size, dtype=jnp.int32)
    attn_mask = jnp.ones((B, S, S), jnp.float32)   # all positions attend

    fwd = jax.jit(functools.partial(encoder_forward, n_heads=n_heads))
    out, attn_list = fwd(params, tokens, attn_mask)
    out = jax.block_until_ready(out)
    for a in attn_list:
        jax.block_until_ready(a)

    assert out.shape == (B, S, d_model)
    assert len(attn_list) == n_layers
    assert all(a.shape == (B, n_heads, S, S) for a in attn_list)
    assert bool(jnp.all(jnp.isfinite(out)))
    # attention rows should sum to ~1 (exact-divide softmax)
    assert bool(jnp.allclose(jnp.sum(attn_list[0], axis=-1), 1.0, atol=1e-3))
    print("KERNEL_OK")
</pallas_src>

<mosaic_0001>
module attributes {stable_mosaic.version = 11 : i64} {
  func.func @_encoder_layer_kernel(%arg0: i32, %arg1: memref<1x8x32xf32, #tpu.memory_space<vmem>>, %arg2: memref<1x8x8xf32, #tpu.memory_space<vmem>>, %arg3: memref<32x96xbf16, #tpu.memory_space<vmem>>, %arg4: memref<32x32xbf16, #tpu.memory_space<vmem>>, %arg5: memref<32x64xbf16, #tpu.memory_space<vmem>>, %arg6: memref<64x32xbf16, #tpu.memory_space<vmem>>, %arg7: memref<8x128xf32, #tpu.memory_space<vmem>>, %arg8: memref<1x8x32xf32, #tpu.memory_space<vmem>>, %arg9: memref<1x4x8x8xf32, #tpu.memory_space<vmem>>) attributes {dimension_semantics = [#tpu.dimension_semantics<parallel>], iteration_bounds = array<i64: 2>, scalar_prefetch = 0 : i64, scratch_operands = 0 : i64, tpu.core_type = #tpu.core_type<tc>, window_params = [{transform_indices = @transform_0, window_bounds = array<i64: 1, 8, 32>}, {transform_indices = @transform_1, window_bounds = array<i64: 1, 8, 8>}, {pipeline_mode = #tpu.pipeline_mode<synchronous>, transform_indices = @transform_2, window_bounds = array<i64: 32, 96>}, {pipeline_mode = #tpu.pipeline_mode<synchronous>, transform_indices = @transform_3, window_bounds = array<i64: 32, 32>}, {pipeline_mode = #tpu.pipeline_mode<synchronous>, transform_indices = @transform_4, window_bounds = array<i64: 32, 64>}, {pipeline_mode = #tpu.pipeline_mode<synchronous>, transform_indices = @transform_5, window_bounds = array<i64: 64, 32>}, {pipeline_mode = #tpu.pipeline_mode<synchronous>, transform_indices = @transform_6, window_bounds = array<i64: 8, 128>}, {transform_indices = @transform_7, window_bounds = array<i64: 1, 8, 32>}, {transform_indices = @transform_8, window_bounds = array<i64: 1, 4, 8, 8>}]} {
    %c0 = arith.constant 0 : index
    %c0_0 = arith.constant 0 : index
    %c0_1 = arith.constant 0 : index
    %0 = vector.load %arg1[%c0, %c0_0, %c0_1] : memref<1x8x32xf32, #tpu.memory_space<vmem>>, vector<1x8x32xf32>
    %1 = vector.shape_cast %0 : vector<1x8x32xf32> to vector<8x32xf32>
    %c0_2 = arith.constant 0 : index
    %c0_3 = arith.constant 0 : index
    %c0_4 = arith.constant 0 : index
    %2 = vector.load %arg2[%c0_2, %c0_3, %c0_4] : memref<1x8x8xf32, #tpu.memory_space<vmem>>, vector<1x8x8xf32>
    %3 = vector.shape_cast %2 : vector<1x8x8xf32> to vector<8x8xf32>
    %c0_5 = arith.constant 0 : index
    %c0_6 = arith.constant 0 : index
    %4 = vector.load %arg7[%c0_5, %c0_6] : memref<8x128xf32, #tpu.memory_space<vmem>>, vector<8x128xf32>
    %5 = vector.extract_strided_slice %4 {offsets = [0, 0], sizes = [1, 96], strides = [1, 1]} : vector<8x128xf32> to vector<1x96xf32>
    %6 = vector.extract_strided_slice %4 {offsets = [1, 0], sizes = [1, 32], strides = [1, 1]} : vector<8x128xf32> to vector<1x32xf32>
    %7 = vector.extract_strided_slice %4 {offsets = [2, 0], sizes = [1, 32], strides = [1, 1]} : vector<8x128xf32> to vector<1x32xf32>
    %8 = vector.extract_strided_slice %4 {offsets = [3, 0], sizes = [1, 32], strides = [1, 1]} : vector<8x128xf32> to vector<1x32xf32>
    %9 = vector.extract_strided_slice %4 {offsets = [4, 0], sizes = [1, 64], strides = [1, 1]} : vector<8x128xf32> to vector<1x64xf32>
    %10 = vector.extract_strided_slice %4 {offsets = [5, 0], sizes = [1, 32], strides = [1, 1]} : vector<8x128xf32> to vector<1x32xf32>
    %11 = vector.extract_strided_slice %4 {offsets = [6, 0], sizes = [1, 32], strides = [1, 1]} : vector<8x128xf32> to vector<1x32xf32>
    %12 = vector.extract_strided_slice %4 {offsets = [7, 0], sizes = [1, 32], strides = [1, 1]} : vector<8x128xf32> to vector<1x32xf32>
    %13 = arith.truncf %1 : vector<8x32xf32> to vector<8x32xbf16>
    %c0_7 = arith.constant 0 : index
    %c0_8 = arith.constant 0 : index
    %14 = vector.load %arg3[%c0_7, %c0_8] : memref<32x96xbf16, #tpu.memory_space<vmem>>, vector<32x96xbf16>
    %cst = arith.constant dense<0.000000e+00> : vector<8x96xf32>
    %15 = tpu.matmul %13, %14, %cst {dimension_numbers = #tpu.dot_dimension_numbers<[1], [0], [0], [1], [0, 0, 1, 1], [], []>} : vector<8x32xbf16>, vector<32x96xbf16>, vector<8x96xf32> -> vector<8x96xf32>
    %16 = vector.broadcast %5 : vector<1x96xf32> to vector<8x96xf32>
    %17 = arith.addf %15, %16 : vector<8x96xf32>
    %18 = vector.extract_strided_slice %17 {offsets = [0, 0], sizes = [8, 8], strides = [1, 1]} : vector<8x96xf32> to vector<8x8xf32>
    %19 = vector.extract_strided_slice %17 {offsets = [0, 8], sizes = [8, 8], strides = [1, 1]} : vector<8x96xf32> to vector<8x8xf32>
    %20 = vector.extract_strided_slice %17 {offsets = [0, 16], sizes = [8, 8], strides = [1, 1]} : vector<8x96xf32> to vector<8x8xf32>
    %21 = vector.extract_strided_slice %17 {offsets = [0, 24], sizes = [8, 8], strides = [1, 1]} : vector<8x96xf32> to vector<8x8xf32>
    %22 = vector.shape_cast %18 : vector<8x8xf32> to vector<1x8x8xf32>
    %23 = vector.shape_cast %19 : vector<8x8xf32> to vector<1x8x8xf32>
    %24 = vector.shape_cast %20 : vector<8x8xf32> to vector<1x8x8xf32>
    %25 = vector.shape_cast %21 : vector<8x8xf32> to vector<1x8x8xf32>
    %26 = tpu.concatenate %22, %23, %24, %25 in 0 : vector<1x8x8xf32>, vector<1x8x8xf32>, vector<1x8x8xf32>, vector<1x8x8xf32> -> vector<4x8x8xf32>
    %27 = arith.truncf %26 : vector<4x8x8xf32> to vector<4x8x8xbf16>
    %28 = vector.extract_strided_slice %17 {offsets = [0, 32], sizes = [8, 8], strides = [1, 1]} : vector<8x96xf32> to vector<8x8xf32>
    %29 = vector.extract_strided_slice %17 {offsets = [0, 40], sizes = [8, 8], strides = [1, 1]} : vector<8x96xf32> to vector<8x8xf32>
    %30 = vector.extract_strided_slice %17 {offsets = [0, 48], sizes = [8, 8], strides = [1, 1]} : vector<8x96xf32> to vector<8x8xf32>
    %31 = vector.extract_strided_slice %17 {offsets = [0, 56], sizes = [8, 8], strides = [1, 1]} : vector<8x96xf32> to vector<8x8xf32>
    %32 = vector.shape_cast %28 : vector<8x8xf32> to vector<1x8x8xf32>
    %33 = vector.shape_cast %29 : vector<8x8xf32> to vector<1x8x8xf32>
    %34 = vector.shape_cast %30 : vector<8x8xf32> to vector<1x8x8xf32>
    %35 = vector.shape_cast %31 : vector<8x8xf32> to vector<1x8x8xf32>
    %36 = tpu.concatenate %32, %33, %34, %35 in 0 : vector<1x8x8xf32>, vector<1x8x8xf32>, vector<1x8x8xf32>, vector<1x8x8xf32> -> vector<4x8x8xf32>
    %37 = arith.truncf %36 : vector<4x8x8xf32> to vector<4x8x8xbf16>
    %38 = vector.extract_strided_slice %17 {offsets = [0, 64], sizes = [8, 8], strides = [1, 1]} : vector<8x96xf32> to vector<8x8xf32>
    %39 = vector.extract_strided_slice %17 {offsets = [0, 72], sizes = [8, 8], strides = [1, 1]} : vector<8x96xf32> to vector<8x8xf32>
    %40 = vector.extract_strided_slice %17 {offsets = [0, 80], sizes = [8, 8], strides = [1, 1]} : vector<8x96xf32> to vector<8x8xf32>
    %41 = vector.extract_strided_slice %17 {offsets = [0, 88], sizes = [8, 8], strides = [1, 1]} : vector<8x96xf32> to vector<8x8xf32>
    %42 = vector.shape_cast %38 : vector<8x8xf32> to vector<1x8x8xf32>
    %43 = vector.shape_cast %39 : vector<8x8xf32> to vector<1x8x8xf32>
    %44 = vector.shape_cast %40 : vector<8x8xf32> to vector<1x8x8xf32>
    %45 = vector.shape_cast %41 : vector<8x8xf32> to vector<1x8x8xf32>
    %46 = tpu.concatenate %42, %43, %44, %45 in 0 : vector<1x8x8xf32>, vector<1x8x8xf32>, vector<1x8x8xf32>, vector<1x8x8xf32> -> vector<4x8x8xf32>
    %47 = arith.truncf %46 : vector<4x8x8xf32> to vector<4x8x8xbf16>
    "tpu.trace_start"() <{level = 10 : i32, message = "hqd,hkd->hqk"}> : () -> ()
    %cst_9 = arith.constant dense<0.000000e+00> : vector<4x8x8xf32>
    %48 = tpu.matmul %27, %37, %cst_9 {dimension_numbers = #tpu.dot_dimension_numbers<[2], [2], [1], [1], [0, 0, 0, 1, 1, 1], [0], [0]>} : vector<4x8x8xbf16>, vector<4x8x8xbf16>, vector<4x8x8xf32> -> vector<4x8x8xf32>
    "tpu.trace_stop"() : () -> ()
    %cst_10 = arith.constant 0.353553385 : f32
    %49 = vector.broadcast %cst_10 : f32 to vector<4x8x8xf32>
    %50 = arith.mulf %48, %49 : vector<4x8x8xf32>
    %51 = vector.shape_cast %3 : vector<8x8xf32> to vector<1x8x8xf32>
    %cst_11 = arith.constant 5.000000e-01 : f32
    %52 = vector.broadcast %cst_11 : f32 to vector<1x8x8xf32>
    %53 = arith.cmpf ogt, %51, %52 : vector<1x8x8xf32>
    %cst_12 = arith.constant -1.000000e+09 : f32
    %54 = vector.shape_cast %53 : vector<1x8x8xi1> to vector<1x8x8xi1>
    %55 = vector.broadcast %54 : vector<1x8x8xi1> to vector<4x8x8xi1>
    %56 = vector.broadcast %cst_12 : f32 to vector<4x8x8xf32>
    %57 = arith.select %55, %50, %56 : vector<4x8x8xi1>, vector<4x8x8xf32>
    %cst_13 = arith.constant dense<0xFF800000> : vector<4x8xf32>
    %58 = vector.multi_reduction <maximumf>, %57, %cst_13 [2] : vector<4x8x8xf32> to vector<4x8xf32>
    %59 = vector.shape_cast %58 : vector<4x8xf32> to vector<4x8x1xf32>
    %60 = vector.broadcast %59 : vector<4x8x1xf32> to vector<4x8x8xf32>
    %61 = arith.subf %57, %60 : vector<4x8x8xf32>
    %62 = math.exp %61 : vector<4x8x8xf32>
    %cst_14 = arith.constant dense<0.000000e+00> : vector<4x8xf32>
    %63 = vector.multi_reduction <add>, %62, %cst_14 [2] : vector<4x8x8xf32> to vector<4x8xf32>
    %64 = vector.shape_cast %63 : vector<4x8xf32> to vector<4x8x1xf32>
    %65 = vector.broadcast %64 : vector<4x8x1xf32> to vector<4x8x8xf32>
    %66 = arith.divf %62, %65 : vector<4x8x8xf32>
    %c0_15 = arith.constant 0 : index
    %c0_16 = arith.constant 0 : index
    %c0_17 = arith.constant 0 : index
    %c0_18 = arith.constant 0 : index
    %67 = vector.load %arg9[%c0_15, %c0_16, %c0_17, %c0_18] : memref<1x4x8x8xf32, #tpu.memory_space<vmem>>, vector<1x4x8x8xf32>
    %68 = vector.shape_cast %67 : vector<1x4x8x8xf32> to vector<4x8x8xf32>
    %69 = vector.shape_cast %66 : vector<4x8x8xf32> to vector<1x4x8x8xf32>
    tpu.vector_store %arg9[%c0_15, %c0_16, %c0_17, %c0_18], %69 {strides = array<i32>} : memref<1x4x8x8xf32, #tpu.memory_space<vmem>>, vector<1x4x8x8xf32>,
    %70 = arith.truncf %66 : vector<4x8x8xf32> to vector<4x8x8xbf16>
    "tpu.trace_start"() <{level = 10 : i32, message = "hqk,hkd->hqd"}> : () -> ()
    %cst_19 = arith.constant dense<0.000000e+00> : vector<4x8x8xf32>
    %71 = tpu.matmul %70, %47, %cst_19 {dimension_numbers = #tpu.dot_dimension_numbers<[2], [1], [1], [2], [0, 0, 0, 1, 1, 2], [0], [0]>} : vector<4x8x8xbf16>, vector<4x8x8xbf16>, vector<4x8x8xf32> -> vector<4x8x8xf32>
    "tpu.trace_stop"() : () -> ()
    %72 = vector.extract_strided_slice %71 {offsets = [0, 0, 0], sizes = [1, 8, 8], strides = [1, 1, 1]} : vector<4x8x8xf32> to vector<1x8x8xf32>
    %73 = vector.shape_cast %72 : vector<1x8x8xf32> to vector<8x8xf32>
    %74 = vector.extract_strided_slice %71 {offsets = [1, 0, 0], sizes = [1, 8, 8], strides = [1, 1, 1]} : vector<4x8x8xf32> to vector<1x8x8xf32>
    %75 = vector.shape_cast %74 : vector<1x8x8xf32> to vector<8x8xf32>
    %76 = vector.extract_strided_slice %71 {offsets = [2, 0, 0], sizes = [1, 8, 8], strides = [1, 1, 1]} : vector<4x8x8xf32> to vector<1x8x8xf32>
    %77 = vector.shape_cast %76 : vector<1x8x8xf32> to vector<8x8xf32>
    %78 = vector.extract_strided_slice %71 {offsets = [3, 0, 0], sizes = [1, 8, 8], strides = [1, 1, 1]} : vector<4x8x8xf32> to vector<1x8x8xf32>
    %79 = vector.shape_cast %78 : vector<1x8x8xf32> to vector<8x8xf32>
    %80 = tpu.concatenate %73, %75, %77, %79 in 1 : vector<8x8xf32>, vector<8x8xf32>, vector<8x8xf32>, vector<8x8xf32> -> vector<8x32xf32>
    %81 = arith.truncf %80 : vector<8x32xf32> to vector<8x32xbf16>
    %c0_20 = arith.constant 0 : index
    %c0_21 = arith.constant 0 : index
    %82 = vector.load %arg4[%c0_20, %c0_21] : memref<32x32xbf16, #tpu.memory_space<vmem>>, vector<32x32xbf16>
    %cst_22 = arith.constant dense<0.000000e+00> : vector<8x32xf32>
    %83 = tpu.matmul %81, %82, %cst_22 {dimension_numbers = #tpu.dot_dimension_numbers<[1], [0], [0], [1], [0, 0, 1, 1], [], []>} : vector<8x32xbf16>, vector<32x32xbf16>, vector<8x32xf32> -> vector<8x32xf32>
    %84 = arith.addf %1, %83 : vector<8x32xf32>
    %85 = vector.broadcast %6 : vector<1x32xf32> to vector<8x32xf32>
    %86 = arith.addf %84, %85 : vector<8x32xf32>
    %cst_23 = arith.constant dense<0.000000e+00> : vector<8xf32>
    %87 = vector.multi_reduction <add>, %86, %cst_23 [1] : vector<8x32xf32> to vector<8xf32>
    %88 = vector.shape_cast %87 : vector<8xf32> to vector<8x1xf32>
    %cst_24 = arith.constant 3.200000e+01 : f32
    %89 = vector.broadcast %cst_24 : f32 to vector<8x1xf32>
    %90 = arith.divf %88, %89 : vector<8x1xf32>
    %91 = arith.mulf %86, %86 : vector<8x32xf32>
    %cst_25 = arith.constant dense<0.000000e+00> : vector<8xf32>
    %92 = vector.multi_reduction <add>, %91, %cst_25 [1] : vector<8x32xf32> to vector<8xf32>
    %93 = vector.shape_cast %92 : vector<8xf32> to vector<8x1xf32>
    %cst_26 = arith.constant 3.200000e+01 : f32
    %94 = vector.broadcast %cst_26 : f32 to vector<8x1xf32>
    %95 = arith.divf %93, %94 : vector<8x1xf32>
    %96 = arith.mulf %90, %90 : vector<8x1xf32>
    %97 = arith.subf %95, %96 : vector<8x1xf32>
    %98 = vector.broadcast %90 : vector<8x1xf32> to vector<8x32xf32>
    %99 = arith.subf %86, %98 : vector<8x32xf32>
    %cst_27 = arith.constant 9.99999974E-6 : f32
    %100 = vector.broadcast %cst_27 : f32 to vector<8x1xf32>
    %101 = arith.addf %97, %100 : vector<8x1xf32>
    %102 = math.rsqrt %101 : vector<8x1xf32>
    %103 = vector.broadcast %102 : vector<8x1xf32> to vector<8x32xf32>
    %104 = arith.mulf %99, %103 : vector<8x32xf32>
    %105 = vector.broadcast %7 : vector<1x32xf32> to vector<8x32xf32>
    %106 = arith.mulf %104, %105 : vector<8x32xf32>
    %107 = vector.broadcast %8 : vector<1x32xf32> to vector<8x32xf32>
    %108 = arith.addf %106, %107 : vector<8x32xf32>
    %109 = arith.truncf %108 : vector<8x32xf32> to vector<8x32xbf16>
    %c0_28 = arith.constant 0 : index
    %c0_29 = arith.constant 0 : index
    %110 = vector.load %arg5[%c0_28, %c0_29] : memref<32x64xbf16, #tpu.memory_space<vmem>>, vector<32x64xbf16>
    %cst_30 = arith.constant dense<0.000000e+00> : vector<8x64xf32>
    %111 = tpu.matmul %109, %110, %cst_30 {dimension_numbers = #tpu.dot_dimension_numbers<[1], [0], [0], [1], [0, 0, 1, 1], [], []>} : vector<8x32xbf16>, vector<32x64xbf16>, vector<8x64xf32> -> vector<8x64xf32>
    %112 = vector.broadcast %9 : vector<1x64xf32> to vector<8x64xf32>
    %113 = arith.addf %111, %112 : vector<8x64xf32>
    %cst_31 = arith.constant 0.000000e+00 : f32
    %114 = vector.broadcast %cst_31 : f32 to vector<8x64xf32>
    %115 = arith.maximumf %113, %114 : vector<8x64xf32>
    %116 = arith.truncf %115 : vector<8x64xf32> to vector<8x64xbf16>
    %c0_32 = arith.constant 0 : index
    %c0_33 = arith.constant 0 : index
    %117 = vector.load %arg6[%c0_32, %c0_33] : memref<64x32xbf16, #tpu.memory_space<vmem>>, vector<64x32xbf16>
    %cst_34 = arith.constant dense<0.000000e+00> : vector<8x32xf32>
    %118 = tpu.matmul %116, %117, %cst_34 {dimension_numbers = #tpu.dot_dimension_numbers<[1], [0], [0], [1], [0, 0, 1, 1], [], []>} : vector<8x64xbf16>, vector<64x32xbf16>, vector<8x32xf32> -> vector<8x32xf32>
    %119 = vector.broadcast %10 : vector<1x32xf32> to vector<8x32xf32>
    %120 = arith.addf %118, %119 : vector<8x32xf32>
    %121 = arith.addf %120, %108 : vector<8x32xf32>
    %cst_35 = arith.constant dense<0.000000e+00> : vector<8xf32>
    %122 = vector.multi_reduction <add>, %121, %cst_35 [1] : vector<8x32xf32> to vector<8xf32>
    %123 = vector.shape_cast %122 : vector<8xf32> to vector<8x1xf32>
    %cst_36 = arith.constant 3.200000e+01 : f32
    %124 = vector.broadcast %cst_36 : f32 to vector<8x1xf32>
    %125 = arith.divf %123, %124 : vector<8x1xf32>
    %126 = arith.mulf %121, %121 : vector<8x32xf32>
    %cst_37 = arith.constant dense<0.000000e+00> : vector<8xf32>
    %127 = vector.multi_reduction <add>, %126, %cst_37 [1] : vector<8x32xf32> to vector<8xf32>
    %128 = vector.shape_cast %127 : vector<8xf32> to vector<8x1xf32>
    %cst_38 = arith.constant 3.200000e+01 : f32
    %129 = vector.broadcast %cst_38 : f32 to vector<8x1xf32>
    %130 = arith.divf %128, %129 : vector<8x1xf32>
    %131 = arith.mulf %125, %125 : vector<8x1xf32>
    %132 = arith.subf %130, %131 : vector<8x1xf32>
    %133 = vector.broadcast %125 : vector<8x1xf32> to vector<8x32xf32>
    %134 = arith.subf %121, %133 : vector<8x32xf32>
    %cst_39 = arith.constant 9.99999974E-6 : f32
    %135 = vector.broadcast %cst_39 : f32 to vector<8x1xf32>
    %136 = arith.addf %132, %135 : vector<8x1xf32>
    %137 = math.rsqrt %136 : vector<8x1xf32>
    %138 = vector.broadcast %137 : vector<8x1xf32> to vector<8x32xf32>
    %139 = arith.mulf %134, %138 : vector<8x32xf32>
    %140 = vector.broadcast %11 : vector<1x32xf32> to vector<8x32xf32>
    %141 = arith.mulf %139, %140 : vector<8x32xf32>
    %142 = vector.broadcast %12 : vector<1x32xf32> to vector<8x32xf32>
    %143 = arith.addf %141, %142 : vector<8x32xf32>
    %c0_40 = arith.constant 0 : index
    %c0_41 = arith.constant 0 : index
    %c0_42 = arith.constant 0 : index
    %144 = vector.load %arg8[%c0_40, %c0_41, %c0_42] : memref<1x8x32xf32, #tpu.memory_space<vmem>>, vector<1x8x32xf32>
    %145 = vector.shape_cast %144 : vector<1x8x32xf32> to vector<8x32xf32>
    %146 = vector.shape_cast %143 : vector<8x32xf32> to vector<1x8x32xf32>
    tpu.vector_store %arg8[%c0_40, %c0_41, %c0_42], %146 {strides = array<i32>} : memref<1x8x32xf32, #tpu.memory_space<vmem>>, vector<1x8x32xf32>,
    return
  }
  func.func @transform_0(%arg0: i32) -> (i32, i32, i32) {
    %c0_i32 = arith.constant 0 : i32
    %c0_i32_0 = arith.constant 0 : i32
    %c0_i32_1 = arith.constant 0 : i32
    return %arg0, %c0_i32, %c0_i32_0 : i32, i32, i32
  }
  func.func @transform_1(%arg0: i32) -> (i32, i32, i32) {
    %c0_i32 = arith.constant 0 : i32
    %c0_i32_0 = arith.constant 0 : i32
    %c0_i32_1 = arith.constant 0 : i32
    return %arg0, %c0_i32, %c0_i32_0 : i32, i32, i32
  }
  func.func @transform_2(%arg0: i32) -> (i32, i32) {
    %c0_i32 = arith.constant 0 : i32
    %c0_i32_0 = arith.constant 0 : i32
    %c0_i32_1 = arith.constant 0 : i32
    return %c0_i32, %c0_i32_0 : i32, i32
  }
  func.func @transform_3(%arg0: i32) -> (i32, i32) {
    %c0_i32 = arith.constant 0 : i32
    %c0_i32_0 = arith.constant 0 : i32
    %c0_i32_1 = arith.constant 0 : i32
    return %c0_i32, %c0_i32_0 : i32, i32
  }
  func.func @transform_4(%arg0: i32) -> (i32, i32) {
    %c0_i32 = arith.constant 0 : i32
    %c0_i32_0 = arith.constant 0 : i32
    %c0_i32_1 = arith.constant 0 : i32
    return %c0_i32, %c0_i32_0 : i32, i32
  }
  func.func @transform_5(%arg0: i32) -> (i32, i32) {
    %c0_i32 = arith.constant 0 : i32
    %c0_i32_0 = arith.constant 0 : i32
    %c0_i32_1 = arith.constant 0 : i32
    return %c0_i32, %c0_i32_0 : i32, i32
  }
  func.func @transform_6(%arg0: i32) -> (i32, i32) {
    %c0_i32 = arith.constant 0 : i32
    %c0_i32_0 = arith.constant 0 : i32
    %c0_i32_1 = arith.constant 0 : i32
    return %c0_i32, %c0_i32_0 : i32, i32
  }
  func.func @transform_7(%arg0: i32) -> (i32, i32, i32) {
    %c0_i32 = arith.constant 0 : i32
    %c0_i32_0 = arith.constant 0 : i32
    %c0_i32_1 = arith.constant 0 : i32
    return %arg0, %c0_i32, %c0_i32_0 : i32, i32, i32
  }
  func.func @transform_8(%arg0: i32) -> (i32, i32, i32, i32) {
    %c0_i32 = arith.constant 0 : i32
    %c0_i32_0 = arith.constant 0 : i32
    %c0_i32_1 = arith.constant 0 : i32
    %c0_i32_2 = arith.constant 0 : i32
    return %arg0, %c0_i32, %c0_i32_0, %c0_i32_1 : i32, i32, i32, i32
  }
}

module attributes {stable_mosaic.version = 11 : i64} {
  func.func @_encoder_layer_kernel(%arg0: i32, %arg1: memref<1x8x32xf32, #tpu.memory_space<vmem>>, %arg2: memref<1x8x8xf32, #tpu.memory_space<vmem>>, %arg3: memref<32x96xbf16, #tpu.memory_space<vmem>>, %arg4: memref<32x32xbf16, #tpu.memory_space<vmem>>, %arg5: memref<32x64xbf16, #tpu.memory_space<vmem>>, %arg6: memref<64x32xbf16, #tpu.memory_space<vmem>>, %arg7: memref<8x128xf32, #tpu.memory_space<vmem>>, %arg8: memref<1x8x32xf32, #tpu.memory_space<vmem>>, %arg9: memref<1x4x8x8xf32, #tpu.memory_space<vmem>>) attributes {dimension_semantics = [#tpu.dimension_semantics<parallel>], iteration_bounds = array<i64: 2>, scalar_prefetch = 0 : i64, scratch_operands = 0 : i64, tpu.core_type = #tpu.core_type<tc>, window_params = [{transform_indices = @transform_0, window_bounds = array<i64: 1, 8, 32>}, {transform_indices = @transform_1, window_bounds = array<i64: 1, 8, 8>}, {pipeline_mode = #tpu.pipeline_mode<synchronous>, transform_indices = @transform_2, window_bounds = array<i64: 32, 96>}, {pipeline_mode = #tpu.pipeline_mode<synchronous>, transform_indices = @transform_3, window_bounds = array<i64: 32, 32>}, {pipeline_mode = #tpu.pipeline_mode<synchronous>, transform_indices = @transform_4, window_bounds = array<i64: 32, 64>}, {pipeline_mode = #tpu.pipeline_mode<synchronous>, transform_indices = @transform_5, window_bounds = array<i64: 64, 32>}, {pipeline_mode = #tpu.pipeline_mode<synchronous>, transform_indices = @transform_6, window_bounds = array<i64: 8, 128>}, {transform_indices = @transform_7, window_bounds = array<i64: 1, 8, 32>}, {transform_indices = @transform_8, window_bounds = array<i64: 1, 4, 8, 8>}]} {
    %c0 = arith.constant 0 : index
    %c0_0 = arith.constant 0 : index
    %c0_1 = arith.constant 0 : index
    %0 = vector.load %arg1[%c0, %c0_0, %c0_1] : memref<1x8x32xf32, #tpu.memory_space<vmem>>, vector<1x8x32xf32>
    %1 = vector.shape_cast %0 : vector<1x8x32xf32> to vector<8x32xf32>
    %c0_2 = arith.constant 0 : index
    %c0_3 = arith.constant 0 : index
    %c0_4 = arith.constant 0 : index
    %2 = vector.load %arg2[%c0_2, %c0_3, %c0_4] : memref<1x8x8xf32, #tpu.memory_space<vmem>>, vector<1x8x8xf32>
    %3 = vector.shape_cast %2 : vector<1x8x8xf32> to vector<8x8xf32>
    %c0_5 = arith.constant 0 : index
    %c0_6 = arith.constant 0 : index
    %4 = vector.load %arg7[%c0_5, %c0_6] : memref<8x128xf32, #tpu.memory_space<vmem>>, vector<8x128xf32>
    %5 = vector.extract_strided_slice %4 {offsets = [0, 0], sizes = [1, 96], strides = [1, 1]} : vector<8x128xf32> to vector<1x96xf32>
    %6 = vector.extract_strided_slice %4 {offsets = [1, 0], sizes = [1, 32], strides = [1, 1]} : vector<8x128xf32> to vector<1x32xf32>
    %7 = vector.extract_strided_slice %4 {offsets = [2, 0], sizes = [1, 32], strides = [1, 1]} : vector<8x128xf32> to vector<1x32xf32>
    %8 = vector.extract_strided_slice %4 {offsets = [3, 0], sizes = [1, 32], strides = [1, 1]} : vector<8x128xf32> to vector<1x32xf32>
    %9 = vector.extract_strided_slice %4 {offsets = [4, 0], sizes = [1, 64], strides = [1, 1]} : vector<8x128xf32> to vector<1x64xf32>
    %10 = vector.extract_strided_slice %4 {offsets = [5, 0], sizes = [1, 32], strides = [1, 1]} : vector<8x128xf32> to vector<1x32xf32>
    %11 = vector.extract_strided_slice %4 {offsets = [6, 0], sizes = [1, 32], strides = [1, 1]} : vector<8x128xf32> to vector<1x32xf32>
    %12 = vector.extract_strided_slice %4 {offsets = [7, 0], sizes = [1, 32], strides = [1, 1]} : vector<8x128xf32> to vector<1x32xf32>
    %13 = arith.truncf %1 : vector<8x32xf32> to vector<8x32xbf16>
    %c0_7 = arith.constant 0 : index
    %c0_8 = arith.constant 0 : index
    %14 = vector.load %arg3[%c0_7, %c0_8] : memref<32x96xbf16, #tpu.memory_space<vmem>>, vector<32x96xbf16>
    %cst = arith.constant dense<0.000000e+00> : vector<8x96xf32>
    %15 = tpu.matmul %13, %14, %cst {dimension_numbers = #tpu.dot_dimension_numbers<[1], [0], [0], [1], [0, 0, 1, 1], [], []>} : vector<8x32xbf16>, vector<32x96xbf16>, vector<8x96xf32> -> vector<8x96xf32>
    %16 = vector.broadcast %5 : vector<1x96xf32> to vector<8x96xf32>
    %17 = arith.addf %15, %16 : vector<8x96xf32>
    %18 = vector.extract_strided_slice %17 {offsets = [0, 0], sizes = [8, 8], strides = [1, 1]} : vector<8x96xf32> to vector<8x8xf32>
    %19 = vector.extract_strided_slice %17 {offsets = [0, 8], sizes = [8, 8], strides = [1, 1]} : vector<8x96xf32> to vector<8x8xf32>
    %20 = vector.extract_strided_slice %17 {offsets = [0, 16], sizes = [8, 8], strides = [1, 1]} : vector<8x96xf32> to vector<8x8xf32>
    %21 = vector.extract_strided_slice %17 {offsets = [0, 24], sizes = [8, 8], strides = [1, 1]} : vector<8x96xf32> to vector<8x8xf32>
    %22 = vector.shape_cast %18 : vector<8x8xf32> to vector<1x8x8xf32>
    %23 = vector.shape_cast %19 : vector<8x8xf32> to vector<1x8x8xf32>
    %24 = vector.shape_cast %20 : vector<8x8xf32> to vector<1x8x8xf32>
    %25 = vector.shape_cast %21 : vector<8x8xf32> to vector<1x8x8xf32>
    %26 = tpu.concatenate %22, %23, %24, %25 in 0 : vector<1x8x8xf32>, vector<1x8x8xf32>, vector<1x8x8xf32>, vector<1x8x8xf32> -> vector<4x8x8xf32>
    %27 = arith.truncf %26 : vector<4x8x8xf32> to vector<4x8x8xbf16>
    %28 = vector.extract_strided_slice %17 {offsets = [0, 32], sizes = [8, 8], strides = [1, 1]} : vector<8x96xf32> to vector<8x8xf32>
    %29 = vector.extract_strided_slice %17 {offsets = [0, 40], sizes = [8, 8], strides = [1, 1]} : vector<8x96xf32> to vector<8x8xf32>
    %30 = vector.extract_strided_slice %17 {offsets = [0, 48], sizes = [8, 8], strides = [1, 1]} : vector<8x96xf32> to vector<8x8xf32>
    %31 = vector.extract_strided_slice %17 {offsets = [0, 56], sizes = [8, 8], strides = [1, 1]} : vector<8x96xf32> to vector<8x8xf32>
    %32 = vector.shape_cast %28 : vector<8x8xf32> to vector<1x8x8xf32>
    %33 = vector.shape_cast %29 : vector<8x8xf32> to vector<1x8x8xf32>
    %34 = vector.shape_cast %30 : vector<8x8xf32> to vector<1x8x8xf32>
    %35 = vector.shape_cast %31 : vector<8x8xf32> to vector<1x8x8xf32>
    %36 = tpu.concatenate %32, %33, %34, %35 in 0 : vector<1x8x8xf32>, vector<1x8x8xf32>, vector<1x8x8xf32>, vector<1x8x8xf32> -> vector<4x8x8xf32>
    %37 = arith.truncf %36 : vector<4x8x8xf32> to vector<4x8x8xbf16>
    %38 = vector.extract_strided_slice %17 {offsets = [0, 64], sizes = [8, 8], strides = [1, 1]} : vector<8x96xf32> to vector<8x8xf32>
    %39 = vector.extract_strided_slice %17 {offsets = [0, 72], sizes = [8, 8], strides = [1, 1]} : vector<8x96xf32> to vector<8x8xf32>
    %40 = vector.extract_strided_slice %17 {offsets = [0, 80], sizes = [8, 8], strides = [1, 1]} : vector<8x96xf32> to vector<8x8xf32>
    %41 = vector.extract_strided_slice %17 {offsets = [0, 88], sizes = [8, 8], strides = [1, 1]} : vector<8x96xf32> to vector<8x8xf32>
    %42 = vector.shape_cast %38 : vector<8x8xf32> to vector<1x8x8xf32>
    %43 = vector.shape_cast %39 : vector<8x8xf32> to vector<1x8x8xf32>
    %44 = vector.shape_cast %40 : vector<8x8xf32> to vector<1x8x8xf32>
    %45 = vector.shape_cast %41 : vector<8x8xf32> to vector<1x8x8xf32>
    %46 = tpu.concatenate %42, %43, %44, %45 in 0 : vector<1x8x8xf32>, vector<1x8x8xf32>, vector<1x8x8xf32>, vector<1x8x8xf32> -> vector<4x8x8xf32>
    %47 = arith.truncf %46 : vector<4x8x8xf32> to vector<4x8x8xbf16>
    "tpu.trace_start"() <{level = 10 : i32, message = "hqd,hkd->hqk"}> : () -> ()
    %cst_9 = arith.constant dense<0.000000e+00> : vector<4x8x8xf32>
    %48 = tpu.matmul %27, %37, %cst_9 {dimension_numbers = #tpu.dot_dimension_numbers<[2], [2], [1], [1], [0, 0, 0, 1, 1, 1], [0], [0]>} : vector<4x8x8xbf16>, vector<4x8x8xbf16>, vector<4x8x8xf32> -> vector<4x8x8xf32>
    "tpu.trace_stop"() : () -> ()
    %cst_10 = arith.constant 0.353553385 : f32
    %49 = vector.broadcast %cst_10 : f32 to vector<4x8x8xf32>
    %50 = arith.mulf %48, %49 : vector<4x8x8xf32>
    %51 = vector.shape_cast %3 : vector<8x8xf32> to vector<1x8x8xf32>
    %cst_11 = arith.constant 5.000000e-01 : f32
    %52 = vector.broadcast %cst_11 : f32 to vector<1x8x8xf32>
    %53 = arith.cmpf ogt, %51, %52 : vector<1x8x8xf32>
    %cst_12 = arith.constant -1.000000e+09 : f32
    %54 = vector.shape_cast %53 : vector<1x8x8xi1> to vector<1x8x8xi1>
    %55 = vector.broadcast %54 : vector<1x8x8xi1> to vector<4x8x8xi1>
    %56 = vector.broadcast %cst_12 : f32 to vector<4x8x8xf32>
    %57 = arith.select %55, %50, %56 : vector<4x8x8xi1>, vector<4x8x8xf32>
    %cst_13 = arith.constant dense<0xFF800000> : vector<4x8xf32>
    %58 = vector.multi_reduction <maximumf>, %57, %cst_13 [2] : vector<4x8x8xf32> to vector<4x8xf32>
    %59 = vector.shape_cast %58 : vector<4x8xf32> to vector<4x8x1xf32>
    %60 = vector.broadcast %59 : vector<4x8x1xf32> to vector<4x8x8xf32>
    %61 = arith.subf %57, %60 : vector<4x8x8xf32>
    %62 = math.exp %61 : vector<4x8x8xf32>
    %cst_14 = arith.constant dense<0.000000e+00> : vector<4x8xf32>
    %63 = vector.multi_reduction <add>, %62, %cst_14 [2] : vector<4x8x8xf32> to vector<4x8xf32>
    %64 = vector.shape_cast %63 : vector<4x8xf32> to vector<4x8x1xf32>
    %65 = vector.broadcast %64 : vector<4x8x1xf32> to vector<4x8x8xf32>
    %66 = arith.divf %62, %65 : vector<4x8x8xf32>
    %c0_15 = arith.constant 0 : index
    %c0_16 = arith.constant 0 : index
    %c0_17 = arith.constant 0 : index
    %c0_18 = arith.constant 0 : index
    %67 = vector.load %arg9[%c0_15, %c0_16, %c0_17, %c0_18] : memref<1x4x8x8xf32, #tpu.memory_space<vmem>>, vector<1x4x8x8xf32>
    %68 = vector.shape_cast %67 : vector<1x4x8x8xf32> to vector<4x8x8xf32>
    %69 = vector.shape_cast %66 : vector<4x8x8xf32> to vector<1x4x8x8xf32>
    tpu.vector_store %arg9[%c0_15, %c0_16, %c0_17, %c0_18], %69 {strides = array<i32>} : memref<1x4x8x8xf32, #tpu.memory_space<vmem>>, vector<1x4x8x8xf32>,
    %70 = arith.truncf %66 : vector<4x8x8xf32> to vector<4x8x8xbf16>
    "tpu.trace_start"() <{level = 10 : i32, message = "hqk,hkd->hqd"}> : () -> ()
    %cst_19 = arith.constant dense<0.000000e+00> : vector<4x8x8xf32>
    %71 = tpu.matmul %70, %47, %cst_19 {dimension_numbers = #tpu.dot_dimension_numbers<[2], [1], [1], [2], [0, 0, 0, 1, 1, 2], [0], [0]>} : vector<4x8x8xbf16>, vector<4x8x8xbf16>, vector<4x8x8xf32> -> vector<4x8x8xf32>
    "tpu.trace_stop"() : () -> ()
    %72 = vector.extract_strided_slice %71 {offsets = [0, 0, 0], sizes = [1, 8, 8], strides = [1, 1, 1]} : vector<4x8x8xf32> to vector<1x8x8xf32>
    %73 = vector.shape_cast %72 : vector<1x8x8xf32> to vector<8x8xf32>
    %74 = vector.extract_strided_slice %71 {offsets = [1, 0, 0], sizes = [1, 8, 8], strides = [1, 1, 1]} : vector<4x8x8xf32> to vector<1x8x8xf32>
    %75 = vector.shape_cast %74 : vector<1x8x8xf32> to vector<8x8xf32>
    %76 = vector.extract_strided_slice %71 {offsets = [2, 0, 0], sizes = [1, 8, 8], strides = [1, 1, 1]} : vector<4x8x8xf32> to vector<1x8x8xf32>
    %77 = vector.shape_cast %76 : vector<1x8x8xf32> to vector<8x8xf32>
    %78 = vector.extract_strided_slice %71 {offsets = [3, 0, 0], sizes = [1, 8, 8], strides = [1, 1, 1]} : vector<4x8x8xf32> to vector<1x8x8xf32>
    %79 = vector.shape_cast %78 : vector<1x8x8xf32> to vector<8x8xf32>
    %80 = tpu.concatenate %73, %75, %77, %79 in 1 : vector<8x8xf32>, vector<8x8xf32>, vector<8x8xf32>, vector<8x8xf32> -> vector<8x32xf32>
    %81 = arith.truncf %80 : vector<8x32xf32> to vector<8x32xbf16>
    %c0_20 = arith.constant 0 : index
    %c0_21 = arith.constant 0 : index
    %82 = vector.load %arg4[%c0_20, %c0_21] : memref<32x32xbf16, #tpu.memory_space<vmem>>, vector<32x32xbf16>
    %cst_22 = arith.constant dense<0.000000e+00> : vector<8x32xf32>
    %83 = tpu.matmul %81, %82, %cst_22 {dimension_numbers = #tpu.dot_dimension_numbers<[1], [0], [0], [1], [0, 0, 1, 1], [], []>} : vector<8x32xbf16>, vector<32x32xbf16>, vector<8x32xf32> -> vector<8x32xf32>
    %84 = arith.addf %1, %83 : vector<8x32xf32>
    %85 = vector.broadcast %6 : vector<1x32xf32> to vector<8x32xf32>
    %86 = arith.addf %84, %85 : vector<8x32xf32>
    %cst_23 = arith.constant dense<0.000000e+00> : vector<8xf32>
    %87 = vector.multi_reduction <add>, %86, %cst_23 [1] : vector<8x32xf32> to vector<8xf32>
    %88 = vector.shape_cast %87 : vector<8xf32> to vector<8x1xf32>
    %cst_24 = arith.constant 3.200000e+01 : f32
    %89 = vector.broadcast %cst_24 : f32 to vector<8x1xf32>
    %90 = arith.divf %88, %89 : vector<8x1xf32>
    %91 = arith.mulf %86, %86 : vector<8x32xf32>
    %cst_25 = arith.constant dense<0.000000e+00> : vector<8xf32>
    %92 = vector.multi_reduction <add>, %91, %cst_25 [1] : vector<8x32xf32> to vector<8xf32>
    %93 = vector.shape_cast %92 : vector<8xf32> to vector<8x1xf32>
    %cst_26 = arith.constant 3.200000e+01 : f32
    %94 = vector.broadcast %cst_26 : f32 to vector<8x1xf32>
    %95 = arith.divf %93, %94 : vector<8x1xf32>
    %96 = arith.mulf %90, %90 : vector<8x1xf32>
    %97 = arith.subf %95, %96 : vector<8x1xf32>
    %98 = vector.broadcast %90 : vector<8x1xf32> to vector<8x32xf32>
    %99 = arith.subf %86, %98 : vector<8x32xf32>
    %cst_27 = arith.constant 9.99999974E-6 : f32
    %100 = vector.broadcast %cst_27 : f32 to vector<8x1xf32>
    %101 = arith.addf %97, %100 : vector<8x1xf32>
    %102 = math.rsqrt %101 : vector<8x1xf32>
    %103 = vector.broadcast %102 : vector<8x1xf32> to vector<8x32xf32>
    %104 = arith.mulf %99, %103 : vector<8x32xf32>
    %105 = vector.broadcast %7 : vector<1x32xf32> to vector<8x32xf32>
    %106 = arith.mulf %104, %105 : vector<8x32xf32>
    %107 = vector.broadcast %8 : vector<1x32xf32> to vector<8x32xf32>
    %108 = arith.addf %106, %107 : vector<8x32xf32>
    %109 = arith.truncf %108 : vector<8x32xf32> to vector<8x32xbf16>
    %c0_28 = arith.constant 0 : index
    %c0_29 = arith.constant 0 : index
    %110 = vector.load %arg5[%c0_28, %c0_29] : memref<32x64xbf16, #tpu.memory_space<vmem>>, vector<32x64xbf16>
    %cst_30 = arith.constant dense<0.000000e+00> : vector<8x64xf32>
    %111 = tpu.matmul %109, %110, %cst_30 {dimension_numbers = #tpu.dot_dimension_numbers<[1], [0], [0], [1], [0, 0, 1, 1], [], []>} : vector<8x32xbf16>, vector<32x64xbf16>, vector<8x64xf32> -> vector<8x64xf32>
    %112 = vector.broadcast %9 : vector<1x64xf32> to vector<8x64xf32>
    %113 = arith.addf %111, %112 : vector<8x64xf32>
    %cst_31 = arith.constant 0.000000e+00 : f32
    %114 = vector.broadcast %cst_31 : f32 to vector<8x64xf32>
    %115 = arith.maximumf %113, %114 : vector<8x64xf32>
    %116 = arith.truncf %115 : vector<8x64xf32> to vector<8x64xbf16>
    %c0_32 = arith.constant 0 : index
    %c0_33 = arith.constant 0 : index
    %117 = vector.load %arg6[%c0_32, %c0_33] : memref<64x32xbf16, #tpu.memory_space<vmem>>, vector<64x32xbf16>
    %cst_34 = arith.constant dense<0.000000e+00> : vector<8x32xf32>
    %118 = tpu.matmul %116, %117, %cst_34 {dimension_numbers = #tpu.dot_dimension_numbers<[1], [0], [0], [1], [0, 0, 1, 1], [], []>} : vector<8x64xbf16>, vector<64x32xbf16>, vector<8x32xf32> -> vector<8x32xf32>
    %119 = vector.broadcast %10 : vector<1x32xf32> to vector<8x32xf32>
    %120 = arith.addf %118, %119 : vector<8x32xf32>
    %121 = arith.addf %120, %108 : vector<8x32xf32>
    %cst_35 = arith.constant dense<0.000000e+00> : vector<8xf32>
    %122 = vector.multi_reduction <add>, %121, %cst_35 [1] : vector<8x32xf32> to vector<8xf32>
    %123 = vector.shape_cast %122 : vector<8xf32> to vector<8x1xf32>
    %cst_36 = arith.constant 3.200000e+01 : f32
    %124 = vector.broadcast %cst_36 : f32 to vector<8x1xf32>
    %125 = arith.divf %123, %124 : vector<8x1xf32>
    %126 = arith.mulf %121, %121 : vector<8x32xf32>
    %cst_37 = arith.constant dense<0.000000e+00> : vector<8xf32>
    %127 = vector.multi_reduction <add>, %126, %cst_37 [1] : vector<8x32xf32> to vector<8xf32>
    %128 = vector.shape_cast %127 : vector<8xf32> to vector<8x1xf32>
    %cst_38 = arith.constant 3.200000e+01 : f32
    %129 = vector.broadcast %cst_38 : f32 to vector<8x1xf32>
    %130 = arith.divf %128, %129 : vector<8x1xf32>
    %131 = arith.mulf %125, %125 : vector<8x1xf32>
    %132 = arith.subf %130, %131 : vector<8x1xf32>
    %133 = vector.broadcast %125 : vector<8x1xf32> to vector<8x32xf32>
    %134 = arith.subf %121, %133 : vector<8x32xf32>
    %cst_39 = arith.constant 9.99999974E-6 : f32
    %135 = vector.broadcast %cst_39 : f32 to vector<8x1xf32>
    %136 = arith.addf %132, %135 : vector<8x1xf32>
    %137 = math.rsqrt %136 : vector<8x1xf32>
    %138 = vector.broadcast %137 : vector<8x1xf32> to vector<8x32xf32>
    %139 = arith.mulf %134, %138 : vector<8x32xf32>
    %140 = vector.broadcast %11 : vector<1x32xf32> to vector<8x32xf32>
    %141 = arith.mulf %139, %140 : vector<8x32xf32>
    %142 = vector.broadcast %12 : vector<1x32xf32> to vector<8x32xf32>
    %143 = arith.addf %141, %142 : vector<8x32xf32>
    %c0_40 = arith.constant 0 : index
    %c0_41 = arith.constant 0 : index
    %c0_42 = arith.constant 0 : index
    %144 = vector.load %arg8[%c0_40, %c0_41, %c0_42] : memref<1x8x32xf32, #tpu.memory_space<vmem>>, vector<1x8x32xf32>
    %145 = vector.shape_cast %144 : vector<1x8x32xf32> to vector<8x32xf32>
    %146 = vector.shape_cast %143 : vector<8x32xf32> to vector<1x8x32xf32>
    tpu.vector_store %arg8[%c0_40, %c0_41, %c0_42], %146 {strides = array<i32>} : memref<1x8x32xf32, #tpu.memory_space<vmem>>, vector<1x8x32xf32>,
    return
  }
  func.func @transform_0(%arg0: i32) -> (i32, i32, i32) {
    %c0_i32 = arith.constant 0 : i32
    %c0_i32_0 = arith.constant 0 : i32
    %c0_i32_1 = arith.constant 0 : i32
    return %arg0, %c0_i32, %c0_i32_0 : i32, i32, i32
  }
  func.func @transform_1(%arg0: i32) -> (i32, i32, i32) {
    %c0_i32 = arith.constant 0 : i32
    %c0_i32_0 = arith.constant 0 : i32
    %c0_i32_1 = arith.constant 0 : i32
    return %arg0, %c0_i32, %c0_i32_0 : i32, i32, i32
  }
  func.func @transform_2(%arg0: i32) -> (i32, i32) {
    %c0_i32 = arith.constant 0 : i32
    %c0_i32_0 = arith.constant 0 : i32
    %c0_i32_1 = arith.constant 0 : i32
    return %c0_i32, %c0_i32_0 : i32, i32
  }
  func.func @transform_3(%arg0: i32) -> (i32, i32) {
    %c0_i32 = arith.constant 0 : i32
    %c0_i32_0 = arith.constant 0 : i32
    %c0_i32_1 = arith.constant 0 : i32
    return %c0_i32, %c0_i32_0 : i32, i32
  }
  func.func @transform_4(%arg0: i32) -> (i32, i32) {
    %c0_i32 = arith.constant 0 : i32
    %c0_i32_0 = arith.constant 0 : i32
    %c0_i32_1 = arith.constant 0 : i32
    return %c0_i32, %c0_i32_0 : i32, i32
  }
  func.func @transform_5(%arg0: i32) -> (i32, i32) {
    %c0_i32 = arith.constant 0 : i32
    %c0_i32_0 = arith.constant 0 : i32
    %c0_i32_1 = arith.constant 0 : i32
    return %c0_i32, %c0_i32_0 : i32, i32
  }
  func.func @transform_6(%arg0: i32) -> (i32, i32) {
    %c0_i32 = arith.constant 0 : i32
    %c0_i32_0 = arith.constant 0 : i32
    %c0_i32_1 = arith.constant 0 : i32
    return %c0_i32, %c0_i32_0 : i32, i32
  }
  func.func @transform_7(%arg0: i32) -> (i32, i32, i32) {
    %c0_i32 = arith.constant 0 : i32
    %c0_i32_0 = arith.constant 0 : i32
    %c0_i32_1 = arith.constant 0 : i32
    return %arg0, %c0_i32, %c0_i32_0 : i32, i32, i32
  }
  func.func @transform_8(%arg0: i32) -> (i32, i32, i32, i32) {
    %c0_i32 = arith.constant 0 : i32
    %c0_i32_0 = arith.constant 0 : i32
    %c0_i32_1 = arith.constant 0 : i32
    %c0_i32_2 = arith.constant 0 : i32
    return %arg0, %c0_i32, %c0_i32_0, %c0_i32_1 : i32, i32, i32, i32
  }
}

</mosaic_0001>

<bundles_post_ra>
// kernel: encoder_forward.2
= control target key start
LH: loop header
LB: loop body
LE: loop exit
PB: predicated region body
PF: predicated region fallthrough
CT: control target
= control target key end

     0   :  { %14 = vsyncpa [#allocation3], 0  ;;  %s1909_s0 = inlined_call_operand.vmem [shape: f32[2,8,32], index: 0, kind: input, shape index: {}]   ;;  %s1910_s1 = inlined_call_operand.vmem [shape: f32[2,8,8], index: 1, kind: input, shape index: {}]   ;;  %s1911_s2 = inlined_call_operand.vmem [shape: bf16[32,96], index: 2, kind: input, shape index: {}]   ;;  %s1912_s3 = inlined_call_operand.vmem [shape: bf16[32,32], index: 3, kind: input, shape index: {}]   ;;  %s1913_s4 = inlined_call_operand.vmem [shape: bf16[32,64], index: 4, kind: input, shape index: {}]   ;;  %s1914_s5 = inlined_call_operand.vmem [shape: bf16[64,32], index: 5, kind: input, shape index: {}]   ;;  %s1915_s6 = inlined_call_operand.vmem [shape: f32[8,128], index: 6, kind: input, shape index: {}]   ;;  %s1916_s7 = inlined_call_operand.vmem [shape: f32[2,8,32], index: 7, kind: output, shape index: {0}]   ;;  %s1917_s8 = inlined_call_operand.hbm [shape: f32[2,4,8,8], index: 8, kind: output, shape index: {1}]  }
   0x1   :  { %16 = vsyncpa [#allocation3 + $0x1], 0  ;;  %s1617_s27 = smov 0   ;;  %s1619_s28 = smov 0  }
   0x2   :  { %s1621_s29 = smov 0   ;;  %s1623_s30 = smov 0  }
   0x3 LB: > { %s1638_s9 = sadd.s32 4294967295, %s1558_s30   ;;  %s1266_s10 = sadd.s32 4294967294, %s1558_s30   ;;  %s1558_s30 = sphi %s1623_s30, %s1923_s30   ;;  %s1554_s29 = sphi %s1621_s29, %s1922_s29   ;;  %s1550_s28 = sphi %s1619_s28, %s1921_s28   ;;  %s1546_s27 = sphi %s1617_s27, %s1920_s27  }
   0x4   : > { %s1642_s11 = sadd.s32 1, %s1558_s30   ;;  %s212_s12 = sadd.s32 1, %s1554_s29 }
   0x5   : > { %s209_s13 = ssub.s32 %s1558_s30, %s1642_s11  ;;  %p222_p0 = scmp.ne.s32.totalorder %s1554_s29, %s1550_s28 }
   0x6   : > { %p210_p1 = scmp.eq.s32.totalorder %s209_s13, 0  ;;  %p223_p2 = scmp.eq.s32.totalorder %s1638_s9, 1 }
   0x7   : > { %p228_p3 = scmp.ne.s32.totalorder %s1550_s28, %s1546_s27  ;;  %p229_p4 = scmp.eq.s32.totalorder %s1266_s10, 1 }
   0x8   : > { %s1653_s14 = scalar_select %p210_p1, %s1554_s29, %s212_s12  }
   0x9   : > { %p1655_p5 = por %p223_p2, %p222_p0  ;;  %p1659_p6 = por %p229_p4, %p228_p3 }
   0xa   : > { %p1269_p7 = scmp.ge.s32.totalorder %s1558_s30, 1  ;;  %p276_p8 = scmp.lt.s32.totalorder %s1558_s30, 3 }
   0xc   : > { %p277_p9 = pnand %p1269_p7, %p276_p8 }
   0xd   : > { %v1466_v0 = vld [vmem:[%s1911_s2] sm:$0xff] (!%p277_p9)   ;;  %v1560_v1 = vmov (!%p277_p9), 0.0   ;;  %v1467_v2 = vld [vmem:[%s1911_s2 + $0x8] sm:$0xff] (!%p277_p9)   ;;  %vm1561_vm0 = vmmov (!%p277_p9), 0   ;;  %p317_p10 = scmp.lt.s32.totalorder (!%p277_p9), %s1638_s9, 1  ;;  %vm354_vm1 = vcmask (!%p277_p9), 261120   ;;  %v338_v5 = vlaneseq (!%p277_p9) }
   0xe   : > { %280 = sbr.rel (%p277_p9) target bundleno = 2342 (0x926), region = 48  ;;  %1332 = vmatprep.subr.bf16.mxu0 (!%p277_p9), %v1560_v1  ;;  %1340 = vmatprep.subr.bf16.mxu1 (!%p277_p9), %v1560_v1  ;;  %v1700_v8 = vld [vmem:[%s1915_s6] sm:$0xff] (!%p277_p9)  ;;  %s1562_s12 = smov (!%p277_p9), 104   ;;  %vm415_vm2 = vcmask (!%p277_p9), 64512   ;;  %vm677_vm4 = vcmask (!%p277_p9), 1043456   ;;  %vm878_vm5 = vcmask (!%p277_p9), 130048  }
   0xf   : > { %1333 = vmatpush3.bf16.msra.mxu0 (!%p277_p9), %v1466_v0  ;;  %1336 = vmatprep.mubr.msk.bf16.mxu0 (!%p277_p9), %vm1561_vm0, %v1560_v1  ;;  %v1694_v6 = vshrl.u32 (!%p277_p9), %v338_v5, 7  ;;  %s1563_s13 = smov (!%p277_p9), 120   ;;  %s1564_s17 = smov (!%p277_p9), 112   ;;  %vm880_vm6 = vcmask (!%p277_p9), 195584   ;;  %vm1076_vm7 = vcmask (!%p277_p9), 523264  }
  0x10   : > { %1334 = vmatprep.subr.bf16.mxu0 (!%p277_p9), %v1560_v1  ;;  %1342 = vmatprep.mubr.msk.bf16.mxu1 (!%p277_p9), %vm1561_vm0, %v1560_v1  ;;  %s1565_s18 = smov (!%p277_p9), 96   ;;  %s1566_s23 = smov (!%p277_p9), 64  }
  0x11   : > { %v340_v7 = vsub.s32 (!%p277_p9), 0, %v1694_v6  ;;  %s314_s24 = sand.u32 (!%p277_p9), 1, %s1550_s28   ;;  %s1568_s19 = smov (!%p277_p9), 16  }
  0x12   : > { %s1569_s20 = smov (!%p277_p9), 24   ;;  %s1301_s10 = sshll.u32 (!%p277_p9), %s1638_s9, 9 }
  0x13   : > { %1335 = vmatpush3.bf16.msra.mxu0 (!%p277_p9), %v1467_v2  ;;  %v341_v9 = vrot.slane (!%p277_p9), %v1700_v8, %v340_v7 }
  0x14   : > { %1346 = vmatprep.subr.bf16.mxu0 (!%p277_p9), %v1560_v1 }
  0x15   : > { %s318_s21 = scalar_select %p317_p10, %s1638_s9, 1 }
  0x16   : > { %s1570_s9 = smov [#allocation2]  }
  0x17   : > { %s1680_s22 = sshll.u32 %s318_s21, 3 }
  0x18   : > { %s320_s25 = scalar_lea.vmem %s1909_s0, %s1680_s22  ;;  %s324_s21 = scalar_lea.vmem %s1910_s1, %s1680_s22 }
  0x19   : > { %v1687_v3 = vld [vmem:[%s320_s25] sm:$0xff]  ;;  %s1270_s25 = sshll.u32 %s314_s24, 5 }
  0x1a   : > { %v333_v4 = vpack.c.bf16 %v1687_v3, %v1687_v3  ;;  %v331_v30 = vld [vmem:[%s324_s21] sm:$0xff]  ;;  %s1770_s26 = scalar_lea.vmem [#allocation2], %s1270_s25 }
  0x1b   : > { %vm613_vm3 = vcmp.gt.f32.partialorder %v331_v30, 0.5 }
  0x1c   : > { %1337 = vmatmul.mubr.msk.bf16.vlgmr.msra.gmra.mrb[0].mxu0 %vm354_vm1, %v333_v4 }
  0x1d   : > { %1348 = vmatprep.mubr.msk.bf16.mxu0 %vm1561_vm0, %v1560_v1 }
  0xef   : > { %v392_v10 = vpop.f32.mrb[0].mxu0 }
  0xf0   : > { %v393_v11 = vadd.f32 %v392_v10, %v341_v9  ;;  %v1338_v12 = vpop.f32.mrb[1].mxu0 }
  0xf1   : > { %v395_v13 = vpop.f32.mrb[2].mxu0 }
  0xf2   : > { %405 = vrot.lane.b32.xlu1 %v393_v11, %s1562_s12  ;;  %399 = vrot.lane.b32.xlu0 %v393_v11, %s1563_s13  ;;  %v1339_v14 = vpop.f32.mrb[3].mxu0  ;;  %v1703_v15 = vpack.c.bf16 %v393_v11, %v393_v11  ;;  %s1168_s12 = sshll.u32 %s1770_s26, 4  ;;  %s1854_s12 = int_to_ptr.vmem [resolvable:$true] %s1168_s12 }
  0xf3   : > { %s1496_s21 = scalar_lea.vmem %s1854_s12, 512 }
  0xf4   : > { %p1497_p11 = scmp.ne.s32.totalorder %s1854_s12, %s1496_s21 }
  0xf6   : > { %402 = vrot.lane.b32.xlu0 %v393_v11, %s1564_s17  ;;  %413 = vrot.lane.b32.xlu1 %v1703_v15, %s1565_s18  ;;  %p1498_p12 = pnand %p1497_p11, %p1655_p5 }
  0xf8   : > { %p1499_p13 = pneg %p1498_p12 }
 0x164   : > { %v406_v16 = vpop.permute.xlu1 %405  ;;  %v400_v17 = vpop.permute.xlu0 %399 }
 0x165   : > { %v1706_v18 = vpack.c.bf16 %v400_v17, %v400_v17  ;;  %v1709_v21 = vpack.c.bf16 %v406_v16, %v406_v16 }
 0x167   : > { %463 = vrot.lane.b32.xlu0 %v1706_v18, %s1565_s18 }
 0x168   : > { %v403_v19 = vpop.permute.xlu0 %402  ;;  %v414_v20 = vpop.permute.xlu1 %413 }
 0x169   : > { %v1711_v22 = vpack.c.bf16 %v403_v19, %v403_v19  ;;  %v420_v23 = vsel %vm415_vm2, %v414_v20, 0 }
 0x16a   : > { %1341 = vmatpush3.bf16.xpose.msra.mxu1 %v420_v23 }
 0x16b   : > { %561 = vrot.lane.b32.xlu0 %v1709_v21, %s1565_s18  ;;  %512 = vrot.lane.b32.xlu1 %v1711_v22, %s1565_s18  ;;  %s1567_s18 = smov 8  }
 0x16c   : > { %1352 = vmatprep.subr.bf16.mxu1 %v1560_v1 }
 0x171   : > { %1343 = vmatmul.mubr.msk.bf16.vlgmr.msra.gmra.mrb[0].mxu1 %vm415_vm2, %v1703_v15 }
 0x172   : > { %1354 = vmatprep.mubr.msk.bf16.mxu1 %vm1561_vm0, %v1560_v1 }
 0x1d9   : > { %v464_v24 = vpop.permute.xlu0 %463 }
 0x1da   : > { %v469_v25 = vsel %vm415_vm2, %v464_v24, 0 }
 0x1db   : > { %1347 = vmatpush3.bf16.xpose.msra.mxu0 %v469_v25 }
 0x1dc   : > { %1358 = vmatprep.subr.bf16.mxu0 %v1560_v1 }
 0x1dd   : > { %v513_v26 = vpop.permute.xlu1 %512  ;;  %v562_v28 = vpop.permute.xlu0 %561 }
 0x1de   : > { %v518_v27 = vsel %vm415_vm2, %v513_v26, 0  ;;  %v567_v29 = vsel %vm415_vm2, %v562_v28, 0 }
 0x1df   : > { %1353 = vmatpush3.bf16.xpose.msra.mxu1 %v518_v27 }
 0x1e0   : > { %1364 = vmatprep.subr.bf16.mxu1 %v1560_v1 }
 0x1e2   : > { %1349 = vmatmul.mubr.msk.bf16.vlgmr.msra.gmra.mrb[4].mxu0 %vm415_vm2, %v1706_v18 }
 0x1e3   : > { %1359 = vmatpush3.bf16.xpose.msra.mxu0 %v567_v29  ;;  %1360 = vmatprep.mubr.msk.bf16.mxu0 %vm1561_vm0, %v1560_v1 }
 0x1e4   : > { %1370 = vmatprep.subr.bf16.mxu0 %v1560_v1 }
 0x1e6   : > { %1355 = vmatmul.mubr.msk.bf16.vlgmr.msra.gmra.mrb[4].mxu1 %vm415_vm2, %v1711_v22 }
 0x1e7   : > { %1366 = vmatprep.mubr.msk.bf16.mxu1 %vm1561_vm0, %v1560_v1 }
 0x1ea   : > { %1361 = vmatmul.mubr.msk.bf16.vlgmr.msra.gmra.mrb[8].mxu0 %vm415_vm2, %v1709_v21 }
 0x1eb   : > { %1372 = vmatprep.mubr.msk.bf16.mxu0 %vm1561_vm0, %v1560_v1 }
 0x244   : > { %v456_v31 = vpop.f32.mrb[0].mxu1 }
 0x245   : > { %v609_v32 = vmul.f32 0.35355338, %v456_v31  ;;  %v1344_v33 = vpop.f32.mrb[1].mxu1 }
 0x246   : > { %v459_v34 = vpop.f32.mrb[2].mxu1 }
 0x247   : > { %v1345_v35 = vpop.f32.mrb[3].mxu1  ;;  %v616_v36 = vsel %vm613_vm3, %v609_v32, -1e+09 }
 0x248   : > { %v620_v37 = vsel %vm415_vm2, %v616_v36, -inf }
 0x249   : > { %621 = vmax.xlane.f32.xlu1 %v620_v37 }
 0x2b5   : > { %v505_v38 = vpop.f32.mrb[4].mxu0 }
 0x2b6   : > { %v610_v39 = vmul.f32 0.35355338, %v505_v38  ;;  %v1350_v40 = vpop.f32.mrb[5].mxu0 }
 0x2b7   : > { %v508_v41 = vpop.f32.mrb[6].mxu0 }
 0x2b8   : > { %v1351_v42 = vpop.f32.mrb[7].mxu0  ;;  %v617_v43 = vsel %vm613_vm3, %v610_v39, -1e+09 }
 0x2b9   : > { %v554_v44 = vpop.f32.mrb[4].mxu1  ;;  %v623_v45 = vsel %vm415_vm2, %v617_v43, -inf }
 0x2ba   : > { %v611_v46 = vmul.f32 0.35355338, %v554_v44  ;;  %v1356_v47 = vpop.f32.mrb[5].mxu1  ;;  %624 = vmax.xlane.f32.xlu0 %v623_v45 }
 0x2bb   : > { %v557_v48 = vpop.f32.mrb[6].mxu1  ;;  %v1468_v47 = vld [vmem:[%s1912_s3] sm:$0xff]  }
 0x2bc   : > { %v1357_v49 = vpop.f32.mrb[7].mxu1  ;;  %v618_v50 = vsel %vm613_vm3, %v611_v46, -1e+09  ;;  %v1469_v48 = vld [vmem:[%s1912_s3 + $0x8] sm:$0xff]  }
 0x2bd   : > { %v603_v51 = vpop.f32.mrb[8].mxu0  ;;  %v626_v52 = vsel %vm415_vm2, %v618_v50, -inf }
 0x2be   : > { %v612_v53 = vmul.f32 0.35355338, %v603_v51  ;;  %627 = vmax.xlane.f32.xlu0 %v626_v52  ;;  %v1362_v54 = vpop.f32.mrb[9].mxu0 }
 0x2bf   : > { %v606_v55 = vpop.f32.mrb[10].mxu0 }
 0x2c0   : > { %v1363_v56 = vpop.f32.mrb[11].mxu0  ;;  %v619_v57 = vsel %vm613_vm3, %v612_v53, -1e+09 }
 0x2c1   : > { %v629_v58 = vsel %vm415_vm2, %v619_v57, -inf }
 0x2c2   : > { %630 = vmax.xlane.f32.xlu1 %v629_v58 }
 0x2d3   : > { %721 = vrot.lane.b32.xlu1 %v1706_v18, %s1566_s23 }
 0x2d4   : > { %672 = vrot.lane.b32.xlu0 %v1703_v15, %s1566_s23 }
 0x2d6   : > { %v622_v59 = vpop.xlane.xlu1 %621 }
 0x2d7   : > { %v632_v60 = vsub.f32 %v616_v36, %v622_v59 }
 0x2d9   : > { %v636_v61 = vmul.f32 1.442695, %v632_v60 }
 0x2db   : > { %1476 = vpow2.f32 %v636_v61 }
 0x2e5   : > { %v1477_v62 = vpop.eup %1476 }
 0x2e6   : > { %v644_v63 = vsel %vm415_vm2, %v1477_v62, 0.0 }
 0x2f3   : > { %645 = vadd.xlane.f32.xlu0 %v644_v63 }
 0x347   : > { %v625_v0 = vpop.xlane.xlu0 %624 }
 0x348   : > { %v633_v2 = vsub.f32 %v617_v43, %v625_v0 }
 0x34a   : > { %v638_v4 = vmul.f32 1.442695, %v633_v2 }
 0x34b   : > { %v628_v5 = vpop.xlane.xlu0 %627 }
 0x34c   : > { %1478 = vpow2.f32 %v638_v4  ;;  %v634_v7 = vsub.f32 %v618_v50, %v628_v5 }
 0x34e   : > { %v640_v9 = vmul.f32 1.442695, %v634_v7  ;;  %v945_v7 = vsub.s32 1, %v1694_v6 }
 0x34f   : > { %v673_v10 = vpop.permute.xlu0 %672  ;;  %v631_v11 = vpop.xlane.xlu1 %630 }
 0x350   : > { %1480 = vpow2.f32 %v640_v9  ;;  %v679_v12 = vsel %vm677_vm4, %v673_v10, 0  ;;  %v635_v13 = vsub.f32 %v619_v57, %v631_v11  ;;  %v946_v9 = vrot.slane %v1700_v8, %v945_v7 }
 0x351   : > { %1365 = vmatpush3.bf16.msra.mxu1 %v679_v12 }
 0x352   : > { %v642_v14 = vmul.f32 1.442695, %v635_v13  ;;  %1376 = vmatprep.subr.bf16.mxu1 %v1560_v1 }
 0x353   : > { %v722_v15 = vpop.permute.xlu1 %721 }
 0x354   : > { %1482 = vpow2.f32 %v642_v14  ;;  %v727_v16 = vsel %vm677_vm4, %v722_v15, 0 }
 0x355   : > { %1371 = vmatpush3.bf16.msra.mxu0 %v727_v16 }
 0x356   : > { %v1479_v17 = vpop.eup %1478  ;;  %1382 = vmatprep.subr.bf16.mxu0 %v1560_v1 }
 0x357   : > { %v647_v18 = vsel %vm415_vm2, %v1479_v17, 0.0 }
 0x358   : > { %648 = vadd.xlane.f32.xlu1 %v647_v18 }
 0x35a   : > { %v1481_v19 = vpop.eup %1480 }
 0x35b   : > { %v650_v20 = vsel %vm415_vm2, %v1481_v19, 0.0 }
 0x35c   : > { %651 = vadd.xlane.f32.xlu0 %v650_v20  ;;  %v1472_v20 = vld [vmem:[%s1914_s5] sm:$0xff]  }
 0x35e   : > { %v1483_v23 = vpop.eup %1482 }
 0x35f   : > { %v653_v24 = vsel %vm415_vm2, %v1483_v23, 0.0 }
 0x360   : > { %654 = vadd.xlane.f32.xlu1 %v653_v24 }
 0x371   : > { %769 = vrot.lane.b32.xlu1 %v1711_v22, %s1566_s23 }
 0x372   : > { %817 = vrot.lane.b32.xlu0 %v1709_v21, %s1566_s23 }
 0x380   : > { %v646_v25 = vpop.xlane.xlu0 %645 }
 0x381   : > { %1484 = vrcp.f32 %v646_v25 }
 0x38b   : > { %v1485_v26 = vpop.eup %1484 }
 0x38c   : > { %v657_v27 = vmul.f32 %v1485_v26, %v1477_v62 }
 0x38e   : > { %664 = vst.msk [vmem:[%s1770_s26] sm:$0xff] %vm415_vm2, %v657_v27  ;;  %v668_v28 = vpack.c.bf16 %v657_v27, %v657_v27 }
 0x390   : > { %1367 = vmatmul.mubr.msk.bf16.vlgmr.msra.gmra.mrb[8].mxu1 %vm415_vm2, %v668_v28 }
 0x391   : > { %1378 = vmatprep.mubr.msk.bf16.mxu1 %vm1561_vm0, %v1560_v1 }
 0x3e5   : > { %v649_v21 = vpop.xlane.xlu1 %648 }
 0x3e6   : > { %1486 = vrcp.f32 %v649_v21 }
 0x3e9   : > { %v652_v22 = vpop.xlane.xlu0 %651 }
 0x3ea   : > { %1488 = vrcp.f32 %v652_v22 }
 0x3ed   : > { %v655_v29 = vpop.xlane.xlu1 %654  ;;  %v818_v33 = vpop.permute.xlu0 %817 }
 0x3ee   : > { %1490 = vrcp.f32 %v655_v29  ;;  %v823_v38 = vsel %vm677_vm4, %v818_v33, 0  ;;  %v966_v29 = vsub.s32 2, %v1694_v6 }
 0x3f0   : > { %v1487_v30 = vpop.eup %1486 }
 0x3f1   : > { %v659_v31 = vmul.f32 %v1487_v30, %v1479_v17  ;;  %v770_v32 = vpop.permute.xlu1 %769  ;;  %v971_v30 = vsub.s32 3, %v1694_v6 }
 0x3f2   : > { %v775_v34 = vsel %vm677_vm4, %v770_v32, 0  ;;  %v967_v32 = vrot.slane %v1700_v8, %v966_v29 }
 0x3f3   : > { %665 = vst.msk [vmem:[%s1770_s26 + $0x8] sm:$0xff] %vm415_vm2, %v659_v31  ;;  %1377 = vmatpush3.bf16.msra.mxu1 %v775_v34  ;;  %v669_v35 = vpack.c.bf16 %v659_v31, %v659_v31 }
 0x3f4   : > { %v1489_v36 = vpop.eup %1488  ;;  %1388 = vmatprep.subr.bf16.mxu1 %v1560_v1 }
 0x3f5   : > { %v661_v37 = vmul.f32 %v1489_v36, %v1481_v19  ;;  %1373 = vmatmul.mubr.msk.bf16.vlgmr.msra.gmra.mrb[12].mxu0 %vm415_vm2, %v669_v35  ;;  %v1470_v19 = vld [vmem:[%s1913_s4] sm:$0xff]   ;;  %v972_v35 = vrot.slane %v1700_v8, %v971_v30 }
 0x3f6   : > { %1383 = vmatpush3.bf16.msra.mxu0 %v823_v38  ;;  %1384 = vmatprep.mubr.msk.bf16.mxu0 %vm1561_vm0, %v1560_v1 }
 0x3f7   : > { %666 = vst.msk [vmem:[%s1770_s26 + $0x10] sm:$0xff] %vm415_vm2, %v661_v37  ;;  %v670_v39 = vpack.c.bf16 %v661_v37, %v661_v37  ;;  %1396 = vmatprep.subr.bf16.mxu0 %v1560_v1 }
 0x3f8   : > { %v1491_v40 = vpop.eup %1490 }
 0x3f9   : > { %v663_v41 = vmul.f32 %v1491_v40, %v1483_v23  ;;  %1379 = vmatmul.mubr.msk.bf16.vlgmr.msra.gmra.mrb[12].mxu1 %vm415_vm2, %v670_v39  ;;  %v1473_v23 = vld [vmem:[%s1914_s5 + $0x8] sm:$0xff]   ;;  %v1474_v39 = vld [vmem:[%s1914_s5 + $0x10] sm:$0xff]   ;;  %v1475_v40 = vld [vmem:[%s1914_s5 + $0x18] sm:$0xff]  }
 0x3fa   : > { %1392 = vmatprep.mubr.msk.bf16.mxu1 %vm1561_vm0, %v1560_v1  ;;  %1389 = vmatpush3.bf16.msra.mxu1 %v1468_v47 }
 0x3fb   : > { %667 = vst.msk [vmem:[%s1770_s26 + $0x18] sm:$0xff] %vm415_vm2, %v663_v41  ;;  %v671_v42 = vpack.c.bf16 %v663_v41, %v663_v41  ;;  %1390 = vmatprep.subr.bf16.mxu1 %v1560_v1  ;;  %v981_v41 = vsub.s32 4, %v1694_v6  ;;  %s1500_s26 = sshll.u32 %s1570_s9, 4  ;;  %s1501_s26 = int_to_ptr.vmem [resolvable:$false] %s1500_s26 }
 0x3fc   : > { %s1502_s23 = scalar_lea.vmem %s1501_s26, 1024  ;;  %p1503_p0 = scmp.lt.s32.totalorder %s1854_s12, %s1501_s26 }
 0x3fd   : > { %1385 = vmatmul.mubr.msk.bf16.vlgmr.msra.gmra.mrb[16].mxu0 %vm415_vm2, %v671_v42  ;;  %v982_v42 = vrot.slane %v1700_v8, %v981_v41  ;;  %p1504_p1 = scmp.lt.s32.totalorder %s1502_s23, %s1496_s21 }
 0x3fe   : > { %1400 = vmatprep.mubr.msk.bf16.mxu0 %vm1561_vm0, %v1560_v1  ;;  %1391 = vmatpush3.bf16.msra.mxu1 %v1469_v48 }
 0x3ff   : > { %1404 = vmatprep.subr.bf16.mxu1 %v1560_v1  ;;  %1397 = vmatpush3.bf16.msra.mxu0 %v1470_v19  ;;  %p1505_p2 = por %p1504_p1, %p1503_p0 }
 0x400   : > { %1398 = vmatprep.subr.bf16.mxu0 %v1560_v1 }
 0x401   : > { %p1506_p3 = pnand %p1505_p2, %p1499_p13 }
 0x463   : > { %v715_v43 = vpop.f32.mrb[8].mxu1 }
 0x464   : > { %v1368_v44 = vpop.f32.mrb[9].mxu1 }
 0x465   : > { %v718_v45 = vpop.f32.mrb[10].mxu1 }
 0x466   : > { %v1369_v46 = vpop.f32.mrb[11].mxu1 }
 0x4c8   : > { %v763_v49 = vpop.f32.mrb[12].mxu0 }
 0x4c9   : > { %866 = vrot.lane.b32.xlu1 %v763_v49, %s1567_s18  ;;  %v1374_v50 = vpop.f32.mrb[13].mxu0 }
 0x4ca   : > { %v766_v51 = vpop.f32.mrb[14].mxu0 }
 0x4cb   : > { %v1375_v52 = vpop.f32.mrb[15].mxu0 }
 0x4cc   : > { %v811_v53 = vpop.f32.mrb[12].mxu1 }
 0x4cd   : > { %870 = vrot.lane.b32.xlu0 %v811_v53, %s1568_s19  ;;  %v1380_v54 = vpop.f32.mrb[13].mxu1  ;;  %s1852_s19 = scalar_lea.hbm %s1917_s8, %s1301_s10 }
 0x4ce   : > { %v814_v55 = vpop.f32.mrb[14].mxu1 }
 0x4cf   : > { %v1381_v56 = vpop.f32.mrb[15].mxu1 }
 0x4d0   : > { %v859_v57 = vpop.f32.mrb[16].mxu0 }
 0x4d1   : > { %874 = vrot.lane.b32.xlu1 %v859_v57, %s1569_s20  ;;  %v1386_v58 = vpop.f32.mrb[17].mxu0  ;;  %s1858_s20 = scalar_lea.sflag [#allocation3], %s314_s24 }
 0x4d2   : > { %v862_v59 = vpop.f32.mrb[18].mxu0 }
 0x4d3   : > { %v1387_v60 = vpop.f32.mrb[19].mxu0 }
 0x53b   : > { %v867_v61 = vpop.permute.xlu1 %866 }
 0x53c   : > { %v877_v63 = vsel %vm415_vm2, %v715_v43, %v867_v61 }
 0x53f   : > { %v871_v62 = vpop.permute.xlu0 %870 }
 0x540   : > { %v879_v0 = vsel %vm878_vm5, %v877_v63, %v871_v62 }
 0x543   : > { %v875_v2 = vpop.permute.xlu1 %874 }
 0x544   : > { %v881_v4 = vsel %vm880_vm6, %v879_v0, %v875_v2 }
 0x545   : > { %v882_v5 = vpack.c.bf16 %v881_v4, %v881_v4 }
 0x547   : > { %1393 = vmatmul.mubr.msk.bf16.vlgmr.msra.gmra.mrb[16].mxu1 %vm354_vm1, %v882_v5 }
 0x548   : > { %1412 = vmatprep.mubr.msk.bf16.mxu1 %vm1561_vm0, %v1560_v1  ;;  %1405 = vmatpush3.bf16.msra.mxu1 %v1472_v20 }
 0x549   : > { %1406 = vmatprep.subr.bf16.mxu1 %v1560_v1 }
 0x54c   : > { %1407 = vmatpush3.bf16.msra.mxu1 %v1473_v23 }
 0x54d   : > { %1408 = vmatprep.subr.bf16.mxu1 %v1560_v1 }
 0x550   : > { %1409 = vmatpush3.bf16.msra.mxu1 %v1474_v39 }
 0x551   : > { %1410 = vmatprep.subr.bf16.mxu1 %v1560_v1  ;;  %v1050_v1 = vsub.s32 5, %v1694_v6 }
 0x553   : > { %v1051_v50 = vrot.slane %v1700_v8, %v1050_v1 }
 0x554   : > { %1411 = vmatpush3.bf16.msra.mxu1 %v1475_v40 }
 0x61a   : > { %v936_v10 = vpop.f32.mrb[16].mxu1 }
 0x61b   : > { %v942_v11 = vadd.f32 %v936_v10, %v1687_v3  ;;  %v1394_v12 = vpop.f32.mrb[17].mxu1  ;;  %v1471_v3 = vld [vmem:[%s1913_s4 + $0x8] sm:$0xff]  }
 0x61c   : > { %v939_v13 = vpop.f32.mrb[18].mxu1  ;;  %1399 = vmatpush3.bf16.msra.mxu0 %v1471_v3 }
 0x61d   : > { %v947_v14 = vadd.f32 %v946_v9, %v942_v11  ;;  %v1395_v15 = vpop.f32.mrb[19].mxu1 }
 0x61f   : > { %v948_v16 = vsel %vm354_vm1, %v947_v14, 0.0  ;;  %v953_v17 = vmul.f32 %v947_v14, %v947_v14 }
 0x620   : > { %949 = vadd.xlane.f32.xlu0 %v948_v16 }
 0x621   : > { %v954_v18 = vsel %vm354_vm1, %v953_v17, 0.0 }
 0x622   : > { %955 = vadd.xlane.f32.xlu1 %v954_v18 }
 0x6ad   : > { %v950_v24 = vpop.xlane.xlu0 %949 }
 0x6ae   : > { %v952_v25 = vmul.f32 0.03125, %v950_v24 }
 0x6af   : > { %v956_v26 = vpop.xlane.xlu1 %955 }
 0x6b0   : > { %v958_v27 = vmul.f32 %v952_v25, %v952_v25  ;;  %v957_v28 = vmul.f32 0.03125, %v956_v26  ;;  %v960_v31 = vsub.f32 %v947_v14, %v952_v25 }
 0x6b2   : > { %v959_v21 = vsub.f32 %v957_v28, %v958_v27 }
 0x6b4   : > { %v961_v22 = vadd.f32 1e-05, %v959_v21 }
 0x6b6   : > { %1492 = vrsqrt.f32 %v961_v22 }
 0x6c0   : > { %v1493_v33 = vpop.eup %1492 }
 0x6c1   : > { %v963_v34 = vmul.f32 %v1493_v33, %v960_v31 }
 0x6c3   : > { %v968_v36 = vmul.f32 %v967_v32, %v963_v34 }
 0x6c5   : > { %v973_v37 = vadd.f32 %v972_v35, %v968_v36 }
 0x6c7   : > { %v974_v38 = vpack.c.bf16 %v973_v37, %v973_v37 }
 0x6c9   : > { %1401 = vmatmul.mubr.msk.bf16.vlgmr.msra.gmra.mrb[20].mxu0 %vm354_vm1, %v974_v38 }
 0x79c   : > { %v1032_v43 = vpop.f32.mrb[20].mxu0 }
 0x79d   : > { %v1033_v44 = vadd.f32 %v1032_v43, %v982_v42  ;;  %v1402_v45 = vpop.f32.mrb[21].mxu0 }
 0x79e   : > { %v1035_v46 = vpop.f32.mrb[22].mxu0 }
 0x79f   : > { %v1038_v47 = vmax.f32 %v1033_v44, 0.0  ;;  %v1403_v48 = vpop.f32.mrb[23].mxu0 }
 0x7a1   : > { %v1039_v49 = vpack.c.bf16 %v1038_v47, %v1038_v47 }
 0x7a3   : > { %1413 = vmatmul.mubr.msk.bf16.vlgmr.msra.gmra.mrb[20].mxu1 %vm1076_vm7, %v1039_v49 }
 0x876   : > { %v1114_v51 = vpop.f32.mrb[20].mxu1 }
 0x877   : > { %v1115_v52 = vadd.f32 %v1114_v51, %v1051_v50  ;;  %v1414_v53 = vpop.f32.mrb[21].mxu1 }
 0x878   : > { %v1117_v54 = vpop.f32.mrb[22].mxu1 }
 0x879   : > { %v1120_v55 = vadd.f32 %v1115_v52, %v973_v37  ;;  %v1415_v56 = vpop.f32.mrb[23].mxu1 }
 0x87b   : > { %v1121_v57 = vsel %vm354_vm1, %v1120_v55, 0.0  ;;  %v1125_v58 = vmul.f32 %v1120_v55, %v1120_v55 }
 0x87c   : > { %1122 = vadd.xlane.f32.xlu0 %v1121_v57 }
 0x87d   : > { %v1126_v59 = vsel %vm354_vm1, %v1125_v58, 0.0 }
 0x880   : > { %1127 = vadd.xlane.f32.xlu0 %v1126_v59 }
 0x881   : > { %1509 = shalt.err (!%p1506_p3)
}
 0x882   : > { %s1510_s24 = scalar_lea.hbm %s1852_s19, 512  ;;  %s1514_s13 = scalar_lea.hbm %s1917_s8, 1024 }
 0x883   : > { %p1511_p4 = scmp.ne.s32.totalorder %s1852_s19, %s1510_s24  ;;  %p1515_p9 = scmp.lt.u32.totalorder %s1852_s19, %s1917_s8 }
 0x884   : > { %p1516_p10 = scmp.lt.u32.totalorder %s1514_s13, %s1510_s24  ;;  %p1518_p12 = scmp.lt.u32.totalorder %s1510_s24, %s1852_s19 }
 0x885   : > { %p1512_p7 = pnand %p1511_p4, %p1655_p5 }
 0x886   : > { %p1517_p11 = por %p1516_p10, %p1515_p9 }
 0x887   : > { %p1513_p8 = pneg %p1512_p7 }
 0x888   : > { %p1519_p13 = por %p1518_p12, %p1517_p11 }
 0x88a   : > { %p1520_p0 = pnand %p1519_p13, %p1513_p8 }
 0x88c   : > { %1523 = shalt.err (!%p1520_p0)
}
 0x88d   : > { %s1571_s21 = smov 128   ;;  %v1138_v5 = vsub.s32 6, %v1694_v6  ;;  %v1143_v7 = vsub.s32 7, %v1694_v6 }
 0x88e   : > { %1416 = dma.vmem_to_hbm [thread:$0]  (%p1655_p5), %s1854_s12, 512, %s1852_s19, %s1858_s20, %s1571_s21, %s1571_s21, %s1567_s18  }
 0x88f   : > { %v1139_v10 = vrot.slane %v1700_v8, %v1138_v5  ;;  %v1144_v12 = vrot.slane %v1700_v8, %v1143_v7  ;;  %s328_s12 = scalar_lea.vmem %s1916_s7, %s1680_s22 }
 0x909   : > { %v1123_v60 = vpop.xlane.xlu0 %1122 }
 0x90a   : > { %v1124_v61 = vmul.f32 0.03125, %v1123_v60 }
 0x90c   : > { %v1130_v63 = vmul.f32 %v1124_v61, %v1124_v61  ;;  %v1132_v9 = vsub.f32 %v1120_v55, %v1124_v61 }
 0x90d   : > { %v1128_v62 = vpop.xlane.xlu0 %1127 }
 0x90e   : > { %v1129_v0 = vmul.f32 0.03125, %v1128_v62 }
 0x910   : > { %v1131_v2 = vsub.f32 %v1129_v0, %v1130_v63 }
 0x912   : > { %v1133_v4 = vadd.f32 1e-05, %v1131_v2 }
 0x914   : > { %1494 = vrsqrt.f32 %v1133_v4 }
 0x91e   : > { %v1495_v11 = vpop.eup %1494 }
 0x91f   : > { %v1135_v13 = vmul.f32 %v1495_v11, %v1132_v9 }
 0x921   : > { %v1140_v14 = vmul.f32 %v1139_v10, %v1135_v13 }
 0x923   : > { %v1145_v15 = vadd.f32 %v1144_v12, %v1140_v14 }
 0x925   : > { %1146 = vst.msk [vmem:[%s328_s12] sm:$0xff] %vm354_vm1, %v1145_v15 }
 0x926 PF: > { %p1422_p5 = scmp.ge.s32.totalorder %s1558_s30, 2  ;;  %s1190_s19 = sand.u32 1, %s1546_s27  }
 0x927   : > { %s1191_s20 = scalar_lea.sflag [#allocation3], %s1190_s19 }
 0x928   : > { %p1419_p1 = pnand %p1422_p5, %p1659_p6 }
 0x92a   : > { %1541 = dma.done.wait (!%p1419_p1), %s1191_s20, 512  }
 0x92b   : > { %1543 = vsyncadd (!%p1419_p1), %s1191_s20, 4294966784  ;;  %p19_p2 = scmp.ge.s32.totalorder %s1642_s11, 4   ;;  %s1920_s27 = smov %s1550_s28 }
 0x92c   : > { %s1921_s28 = smov %s1554_s29  ;;  %s1922_s29 = smov %s1653_s14 }
 0x92d   : > { %s1923_s30 = smov %s1642_s11  ;;  %21 = sbr.rel (!%p19_p2) target bundleno = 3 (0x3), region = 98 }
 0x934   :  { %1196 = vsyncpa [#allocation3], 1 }
 0x935   :  { %1198 = vsyncpa [#allocation3 + $0x1], 1 }

// kernel: encoder_forward.3
= control target key start
LH: loop header
LB: loop body
LE: loop exit
PB: predicated region body
PF: predicated region fallthrough
CT: control target
= control target key end

     0   :  { %14 = vsyncpa [#allocation3], 0  ;;  %s1997_s0 = inlined_call_operand.vmem [shape: f32[2,8,32], index: 0, kind: input, shape index: {}]   ;;  %s1998_s1 = inlined_call_operand.vmem [shape: f32[2,8,8], index: 1, kind: input, shape index: {}]   ;;  %s1999_s2 = inlined_call_operand.vmem [shape: bf16[32,96], index: 2, kind: input, shape index: {}]   ;;  %s2000_s3 = inlined_call_operand.vmem [shape: bf16[32,32], index: 3, kind: input, shape index: {}]   ;;  %s2001_s4 = inlined_call_operand.vmem [shape: bf16[32,64], index: 4, kind: input, shape index: {}]   ;;  %s2002_s5 = inlined_call_operand.vmem [shape: bf16[64,32], index: 5, kind: input, shape index: {}]   ;;  %s2003_s6 = inlined_call_operand.vmem [shape: f32[8,128], index: 6, kind: input, shape index: {}]   ;;  %s2004_s7 = inlined_call_operand.hbm [shape: f32[2,8,32], index: 7, kind: output, shape index: {0}]   ;;  %s2005_s8 = inlined_call_operand.hbm [shape: f32[2,4,8,8], index: 8, kind: output, shape index: {1}]  }
   0x1   :  { %16 = vsyncpa [#allocation3 + $0x1], 0 }
   0x2   :  { %17 = vsyncpa [#allocation5], 0 }
   0x3   :  { %19 = vsyncpa [#allocation5 + $0x1], 0  ;;  %s1676_s27 = smov 0   ;;  %s1678_s28 = smov 0  }
   0x4   :  { %s1680_s29 = smov 0   ;;  %s1682_s30 = smov 0  }
   0x5 LB: > { %s1697_s9 = sadd.s32 4294967295, %s1616_s30   ;;  %s1285_s10 = sadd.s32 4294967294, %s1616_s30   ;;  %s1616_s30 = sphi %s1682_s30, %s2011_s30   ;;  %s1612_s29 = sphi %s1680_s29, %s2010_s29   ;;  %s1608_s28 = sphi %s1678_s28, %s2009_s28   ;;  %s1604_s27 = sphi %s1676_s27, %s2008_s27  }
   0x6   : > { %s1701_s11 = sadd.s32 1, %s1616_s30   ;;  %s189_s12 = sadd.s32 1, %s1612_s29 }
   0x7   : > { %s186_s13 = ssub.s32 %s1616_s30, %s1701_s11  ;;  %p199_p0 = scmp.ne.s32.totalorder %s1612_s29, %s1608_s28 }
   0x8   : > { %p187_p1 = scmp.eq.s32.totalorder %s186_s13, 0  ;;  %p200_p2 = scmp.eq.s32.totalorder %s1697_s9, 1 }
   0x9   : > { %p205_p3 = scmp.ne.s32.totalorder %s1608_s28, %s1604_s27  ;;  %p206_p4 = scmp.eq.s32.totalorder %s1285_s10, 1 }
   0xa   : > { %s1712_s14 = scalar_select %p187_p1, %s1612_s29, %s189_s12  }
   0xb   : > { %p1714_p5 = por %p200_p2, %p199_p0  ;;  %p1718_p6 = por %p206_p4, %p205_p3 }
   0xc   : > { %p1288_p7 = scmp.ge.s32.totalorder %s1616_s30, 1  ;;  %p279_p8 = scmp.lt.s32.totalorder %s1616_s30, 3 }
   0xe   : > { %p280_p9 = pnand %p1288_p7, %p279_p8 }
   0xf   : > { %v1492_v0 = vld [vmem:[%s1999_s2] sm:$0xff] (!%p280_p9)   ;;  %v1618_v1 = vmov (!%p280_p9), 0.0   ;;  %v1493_v2 = vld [vmem:[%s1999_s2 + $0x8] sm:$0xff] (!%p280_p9)   ;;  %vm1619_vm0 = vmmov (!%p280_p9), 0   ;;  %p321_p10 = scmp.lt.s32.totalorder (!%p280_p9), %s1697_s9, 1  ;;  %vm354_vm1 = vcmask (!%p280_p9), 261120   ;;  %v338_v5 = vlaneseq (!%p280_p9) }
  0x10   : > { %283 = sbr.rel (%p280_p9) target bundleno = 2357 (0x935), region = 48  ;;  %1353 = vmatprep.subr.bf16.mxu0 (!%p280_p9), %v1618_v1  ;;  %1361 = vmatprep.subr.bf16.mxu1 (!%p280_p9), %v1618_v1  ;;  %v1761_v8 = vld [vmem:[%s2003_s6] sm:$0xff] (!%p280_p9)  ;;  %s1620_s12 = smov (!%p280_p9), 104   ;;  %vm415_vm2 = vcmask (!%p280_p9), 64512   ;;  %vm677_vm4 = vcmask (!%p280_p9), 1043456   ;;  %vm878_vm5 = vcmask (!%p280_p9), 130048  }
  0x11   : > { %1354 = vmatpush3.bf16.msra.mxu0 (!%p280_p9), %v1492_v0  ;;  %1357 = vmatprep.mubr.msk.bf16.mxu0 (!%p280_p9), %vm1619_vm0, %v1618_v1  ;;  %v1755_v6 = vshrl.u32 (!%p280_p9), %v338_v5, 7  ;;  %s1621_s13 = smov (!%p280_p9), 120   ;;  %s1622_s17 = smov (!%p280_p9), 112   ;;  %vm880_vm6 = vcmask (!%p280_p9), 195584   ;;  %vm1076_vm7 = vcmask (!%p280_p9), 523264  }
  0x12   : > { %1355 = vmatprep.subr.bf16.mxu0 (!%p280_p9), %v1618_v1  ;;  %1363 = vmatprep.mubr.msk.bf16.mxu1 (!%p280_p9), %vm1619_vm0, %v1618_v1  ;;  %s1623_s18 = smov (!%p280_p9), 96   ;;  %s1627_s19 = smov (!%p280_p9), 24  }
  0x13   : > { %v340_v7 = vsub.s32 (!%p280_p9), 0, %v1755_v6 }
  0x15   : > { %1356 = vmatpush3.bf16.msra.mxu0 (!%p280_p9), %v1493_v2  ;;  %v341_v9 = vrot.slane (!%p280_p9), %v1761_v8, %v340_v7 }
  0x16   : > { %1367 = vmatprep.subr.bf16.mxu0 (!%p280_p9), %v1618_v1 }
  0x17   : > { %s1739_s21 = scalar_select %p321_p10, %s1697_s9, 1 }
  0x19   : > { %s1291_s22 = sshll.u32 %s1739_s21, 3  ;;  %s1624_s21 = smov 64  }
  0x1a   : > { %s324_s25 = scalar_lea.vmem %s1997_s0, %s1291_s22  ;;  %s328_s23 = scalar_lea.vmem %s1998_s1, %s1291_s22 }
  0x1b   : > { %v1748_v3 = vld [vmem:[%s324_s25] sm:$0xff]  ;;  %s1830_s22 = sand.u32 1, %s1608_s28  }
  0x1c   : > { %v333_v4 = vpack.c.bf16 %v1748_v3, %v1748_v3  ;;  %v331_v30 = vld [vmem:[%s328_s23] sm:$0xff]  ;;  %s1290_s24 = sshll.u32 %s1830_s22, 5 }
  0x1d   : > { %vm613_vm3 = vcmp.gt.f32.partialorder %v331_v30, 0.5  ;;  %s1833_s25 = scalar_lea.vmem [#allocation4], %s1290_s24  ;;  %s1322_s24 = sshll.u32 %s1697_s9, 9 }
  0x1e   : > { %1358 = vmatmul.mubr.msk.bf16.vlgmr.msra.gmra.mrb[0].mxu0 %vm354_vm1, %v333_v4 }
  0x1f   : > { %1369 = vmatprep.mubr.msk.bf16.mxu0 %vm1619_vm0, %v1618_v1 }
  0xf1   : > { %v392_v10 = vpop.f32.mrb[0].mxu0 }
  0xf2   : > { %v393_v11 = vadd.f32 %v392_v10, %v341_v9  ;;  %v1359_v12 = vpop.f32.mrb[1].mxu0 }
  0xf3   : > { %v395_v13 = vpop.f32.mrb[2].mxu0 }
  0xf4   : > { %405 = vrot.lane.b32.xlu1 %v393_v11, %s1620_s12  ;;  %399 = vrot.lane.b32.xlu0 %v393_v11, %s1621_s13  ;;  %v1360_v14 = vpop.f32.mrb[3].mxu0  ;;  %v1764_v15 = vpack.c.bf16 %v393_v11, %v393_v11  ;;  %s1917_s12 = scalar_lea.hbm %s2005_s8, %s1322_s24  ;;  %s1153_s13 = scalar_lea.sflag [#allocation5], %s1830_s22 }
  0xf8   : > { %402 = vrot.lane.b32.xlu0 %v393_v11, %s1622_s17  ;;  %413 = vrot.lane.b32.xlu1 %v1764_v15, %s1623_s18  ;;  %s1625_s17 = smov 8  }
 0x166   : > { %v406_v16 = vpop.permute.xlu1 %405  ;;  %v400_v17 = vpop.permute.xlu0 %399 }
 0x167   : > { %v1767_v18 = vpack.c.bf16 %v400_v17, %v400_v17  ;;  %v1770_v21 = vpack.c.bf16 %v406_v16, %v406_v16 }
 0x169   : > { %463 = vrot.lane.b32.xlu0 %v1767_v18, %s1623_s18 }
 0x16a   : > { %v403_v19 = vpop.permute.xlu0 %402  ;;  %v414_v20 = vpop.permute.xlu1 %413 }
 0x16b   : > { %v1772_v22 = vpack.c.bf16 %v403_v19, %v403_v19  ;;  %v420_v23 = vsel %vm415_vm2, %v414_v20, 0 }
 0x16c   : > { %1362 = vmatpush3.bf16.xpose.msra.mxu1 %v420_v23 }
 0x16d   : > { %561 = vrot.lane.b32.xlu0 %v1770_v21, %s1623_s18  ;;  %512 = vrot.lane.b32.xlu1 %v1772_v22, %s1623_s18  ;;  %s1626_s18 = smov 16  }
 0x16e   : > { %1373 = vmatprep.subr.bf16.mxu1 %v1618_v1 }
 0x173   : > { %1364 = vmatmul.mubr.msk.bf16.vlgmr.msra.gmra.mrb[0].mxu1 %vm415_vm2, %v1764_v15 }
 0x174   : > { %1375 = vmatprep.mubr.msk.bf16.mxu1 %vm1619_vm0, %v1618_v1 }
 0x1db   : > { %v464_v24 = vpop.permute.xlu0 %463 }
 0x1dc   : > { %v469_v25 = vsel %vm415_vm2, %v464_v24, 0 }
 0x1dd   : > { %1368 = vmatpush3.bf16.xpose.msra.mxu0 %v469_v25 }
 0x1de   : > { %1379 = vmatprep.subr.bf16.mxu0 %v1618_v1 }
 0x1df   : > { %v513_v26 = vpop.permute.xlu1 %512  ;;  %v562_v28 = vpop.permute.xlu0 %561 }
 0x1e0   : > { %v518_v27 = vsel %vm415_vm2, %v513_v26, 0  ;;  %v567_v29 = vsel %vm415_vm2, %v562_v28, 0 }
 0x1e1   : > { %1374 = vmatpush3.bf16.xpose.msra.mxu1 %v518_v27 }
 0x1e2   : > { %1385 = vmatprep.subr.bf16.mxu1 %v1618_v1 }
 0x1e4   : > { %1370 = vmatmul.mubr.msk.bf16.vlgmr.msra.gmra.mrb[4].mxu0 %vm415_vm2, %v1767_v18 }
 0x1e5   : > { %1380 = vmatpush3.bf16.xpose.msra.mxu0 %v567_v29  ;;  %1381 = vmatprep.mubr.msk.bf16.mxu0 %vm1619_vm0, %v1618_v1 }
 0x1e6   : > { %1391 = vmatprep.subr.bf16.mxu0 %v1618_v1 }
 0x1e8   : > { %1376 = vmatmul.mubr.msk.bf16.vlgmr.msra.gmra.mrb[4].mxu1 %vm415_vm2, %v1772_v22 }
 0x1e9   : > { %1387 = vmatprep.mubr.msk.bf16.mxu1 %vm1619_vm0, %v1618_v1 }
 0x1ec   : > { %1382 = vmatmul.mubr.msk.bf16.vlgmr.msra.gmra.mrb[8].mxu0 %vm415_vm2, %v1770_v21 }
 0x1ed   : > { %1393 = vmatprep.mubr.msk.bf16.mxu0 %vm1619_vm0, %v1618_v1 }
 0x246   : > { %v456_v31 = vpop.f32.mrb[0].mxu1 }
 0x247   : > { %v609_v32 = vmul.f32 0.35355338, %v456_v31  ;;  %v1365_v33 = vpop.f32.mrb[1].mxu1 }
 0x248   : > { %v459_v34 = vpop.f32.mrb[2].mxu1 }
 0x249   : > { %v1366_v35 = vpop.f32.mrb[3].mxu1  ;;  %v616_v36 = vsel %vm613_vm3, %v609_v32, -1e+09 }
 0x24a   : > { %v620_v37 = vsel %vm415_vm2, %v616_v36, -inf }
 0x24b   : > { %621 = vmax.xlane.f32.xlu1 %v620_v37 }
 0x2b7   : > { %v505_v38 = vpop.f32.mrb[4].mxu0 }
 0x2b8   : > { %v610_v39 = vmul.f32 0.35355338, %v505_v38  ;;  %v1371_v40 = vpop.f32.mrb[5].mxu0 }
 0x2b9   : > { %v508_v41 = vpop.f32.mrb[6].mxu0 }
 0x2ba   : > { %v1372_v42 = vpop.f32.mrb[7].mxu0  ;;  %v617_v43 = vsel %vm613_vm3, %v610_v39, -1e+09 }
 0x2bb   : > { %v554_v44 = vpop.f32.mrb[4].mxu1  ;;  %v623_v45 = vsel %vm415_vm2, %v617_v43, -inf }
 0x2bc   : > { %v611_v46 = vmul.f32 0.35355338, %v554_v44  ;;  %v1377_v47 = vpop.f32.mrb[5].mxu1  ;;  %624 = vmax.xlane.f32.xlu0 %v623_v45 }
 0x2bd   : > { %v557_v48 = vpop.f32.mrb[6].mxu1  ;;  %v1494_v47 = vld [vmem:[%s2000_s3] sm:$0xff]  }
 0x2be   : > { %v1378_v49 = vpop.f32.mrb[7].mxu1  ;;  %v618_v50 = vsel %vm613_vm3, %v611_v46, -1e+09  ;;  %v1495_v48 = vld [vmem:[%s2000_s3 + $0x8] sm:$0xff]  }
 0x2bf   : > { %v603_v51 = vpop.f32.mrb[8].mxu0  ;;  %v626_v52 = vsel %vm415_vm2, %v618_v50, -inf }
 0x2c0   : > { %v612_v53 = vmul.f32 0.35355338, %v603_v51  ;;  %627 = vmax.xlane.f32.xlu0 %v626_v52  ;;  %v1383_v54 = vpop.f32.mrb[9].mxu0 }
 0x2c1   : > { %v606_v55 = vpop.f32.mrb[10].mxu0 }
 0x2c2   : > { %v1384_v56 = vpop.f32.mrb[11].mxu0  ;;  %v619_v57 = vsel %vm613_vm3, %v612_v53, -1e+09 }
 0x2c3   : > { %v629_v58 = vsel %vm415_vm2, %v619_v57, -inf }
 0x2c4   : > { %630 = vmax.xlane.f32.xlu1 %v629_v58 }
 0x2d5   : > { %721 = vrot.lane.b32.xlu1 %v1767_v18, %s1624_s21 }
 0x2d6   : > { %672 = vrot.lane.b32.xlu0 %v1764_v15, %s1624_s21 }
 0x2d8   : > { %v622_v59 = vpop.xlane.xlu1 %621 }
 0x2d9   : > { %v632_v60 = vsub.f32 %v616_v36, %v622_v59 }
 0x2db   : > { %v636_v61 = vmul.f32 1.442695, %v632_v60 }
 0x2dd   : > { %1502 = vpow2.f32 %v636_v61 }
 0x2e7   : > { %v1503_v62 = vpop.eup %1502 }
 0x2e8   : > { %v644_v63 = vsel %vm415_vm2, %v1503_v62, 0.0 }
 0x2f5   : > { %645 = vadd.xlane.f32.xlu0 %v644_v63 }
 0x349   : > { %v625_v0 = vpop.xlane.xlu0 %624 }
 0x34a   : > { %v633_v2 = vsub.f32 %v617_v43, %v625_v0 }
 0x34c   : > { %v638_v4 = vmul.f32 1.442695, %v633_v2 }
 0x34d   : > { %v628_v5 = vpop.xlane.xlu0 %627 }
 0x34e   : > { %1504 = vpow2.f32 %v638_v4  ;;  %v634_v7 = vsub.f32 %v618_v50, %v628_v5 }
 0x350   : > { %v640_v9 = vmul.f32 1.442695, %v634_v7  ;;  %v945_v7 = vsub.s32 1, %v1755_v6 }
 0x351   : > { %v673_v10 = vpop.permute.xlu0 %672  ;;  %v631_v11 = vpop.xlane.xlu1 %630 }
 0x352   : > { %1506 = vpow2.f32 %v640_v9  ;;  %v679_v12 = vsel %vm677_vm4, %v673_v10, 0  ;;  %v635_v13 = vsub.f32 %v619_v57, %v631_v11  ;;  %v946_v9 = vrot.slane %v1761_v8, %v945_v7 }
 0x353   : > { %1386 = vmatpush3.bf16.msra.mxu1 %v679_v12 }
 0x354   : > { %v642_v14 = vmul.f32 1.442695, %v635_v13  ;;  %1397 = vmatprep.subr.bf16.mxu1 %v1618_v1 }
 0x355   : > { %v722_v15 = vpop.permute.xlu1 %721 }
 0x356   : > { %1508 = vpow2.f32 %v642_v14  ;;  %v727_v16 = vsel %vm677_vm4, %v722_v15, 0 }
 0x357   : > { %1392 = vmatpush3.bf16.msra.mxu0 %v727_v16 }
 0x358   : > { %v1505_v17 = vpop.eup %1504  ;;  %1403 = vmatprep.subr.bf16.mxu0 %v1618_v1 }
 0x359   : > { %v647_v18 = vsel %vm415_vm2, %v1505_v17, 0.0 }
 0x35a   : > { %648 = vadd.xlane.f32.xlu1 %v647_v18 }
 0x35c   : > { %v1507_v19 = vpop.eup %1506 }
 0x35d   : > { %v650_v20 = vsel %vm415_vm2, %v1507_v19, 0.0 }
 0x35e   : > { %651 = vadd.xlane.f32.xlu0 %v650_v20  ;;  %v1498_v20 = vld [vmem:[%s2002_s5] sm:$0xff]  }
 0x360   : > { %v1509_v23 = vpop.eup %1508 }
 0x361   : > { %v653_v24 = vsel %vm415_vm2, %v1509_v23, 0.0 }
 0x362   : > { %654 = vadd.xlane.f32.xlu1 %v653_v24 }
 0x373   : > { %769 = vrot.lane.b32.xlu1 %v1772_v22, %s1624_s21 }
 0x374   : > { %817 = vrot.lane.b32.xlu0 %v1770_v21, %s1624_s21  ;;  %s1179_s21 = sshll.u32 %s1833_s25, 4  ;;  %s1912_s21 = int_to_ptr.vmem [resolvable:$true] %s1179_s21 }
 0x382   : > { %v646_v25 = vpop.xlane.xlu0 %645 }
 0x383   : > { %1510 = vrcp.f32 %v646_v25 }
 0x38d   : > { %v1511_v26 = vpop.eup %1510 }
 0x38e   : > { %v657_v27 = vmul.f32 %v1511_v26, %v1503_v62 }
 0x390   : > { %v668_v28 = vpack.c.bf16 %v657_v27, %v657_v27  ;;  %664 = vst.msk [vmem:[%s1833_s25] sm:$0xff] %vm415_vm2, %v657_v27 }
 0x392   : > { %1388 = vmatmul.mubr.msk.bf16.vlgmr.msra.gmra.mrb[8].mxu1 %vm415_vm2, %v668_v28 }
 0x393   : > { %1399 = vmatprep.mubr.msk.bf16.mxu1 %vm1619_vm0, %v1618_v1 }
 0x3e7   : > { %v649_v21 = vpop.xlane.xlu1 %648 }
 0x3e8   : > { %1512 = vrcp.f32 %v649_v21 }
 0x3eb   : > { %v652_v22 = vpop.xlane.xlu0 %651 }
 0x3ec   : > { %1514 = vrcp.f32 %v652_v22 }
 0x3ef   : > { %v655_v29 = vpop.xlane.xlu1 %654  ;;  %v818_v33 = vpop.permute.xlu0 %817 }
 0x3f0   : > { %1516 = vrcp.f32 %v655_v29  ;;  %v823_v38 = vsel %vm677_vm4, %v818_v33, 0  ;;  %v966_v29 = vsub.s32 2, %v1755_v6 }
 0x3f2   : > { %v1513_v30 = vpop.eup %1512 }
 0x3f3   : > { %v659_v31 = vmul.f32 %v1513_v30, %v1505_v17  ;;  %v770_v32 = vpop.permute.xlu1 %769  ;;  %v971_v30 = vsub.s32 3, %v1755_v6 }
 0x3f4   : > { %v775_v34 = vsel %vm677_vm4, %v770_v32, 0  ;;  %v967_v32 = vrot.slane %v1761_v8, %v966_v29 }
 0x3f5   : > { %1398 = vmatpush3.bf16.msra.mxu1 %v775_v34  ;;  %v669_v35 = vpack.c.bf16 %v659_v31, %v659_v31  ;;  %665 = vst.msk [vmem:[%s1833_s25 + $0x8] sm:$0xff] %vm415_vm2, %v659_v31 }
 0x3f6   : > { %v1515_v36 = vpop.eup %1514  ;;  %1409 = vmatprep.subr.bf16.mxu1 %v1618_v1 }
 0x3f7   : > { %v661_v37 = vmul.f32 %v1515_v36, %v1507_v19  ;;  %1394 = vmatmul.mubr.msk.bf16.vlgmr.msra.gmra.mrb[12].mxu0 %vm415_vm2, %v669_v35  ;;  %v1496_v19 = vld [vmem:[%s2001_s4] sm:$0xff]   ;;  %v972_v35 = vrot.slane %v1761_v8, %v971_v30 }
 0x3f8   : > { %1404 = vmatpush3.bf16.msra.mxu0 %v823_v38  ;;  %1405 = vmatprep.mubr.msk.bf16.mxu0 %vm1619_vm0, %v1618_v1 }
 0x3f9   : > { %v670_v39 = vpack.c.bf16 %v661_v37, %v661_v37  ;;  %1417 = vmatprep.subr.bf16.mxu0 %v1618_v1  ;;  %666 = vst.msk [vmem:[%s1833_s25 + $0x10] sm:$0xff] %vm415_vm2, %v661_v37 }
 0x3fa   : > { %v1517_v40 = vpop.eup %1516 }
 0x3fb   : > { %v663_v41 = vmul.f32 %v1517_v40, %v1509_v23  ;;  %1400 = vmatmul.mubr.msk.bf16.vlgmr.msra.gmra.mrb[12].mxu1 %vm415_vm2, %v670_v39  ;;  %v1499_v23 = vld [vmem:[%s2002_s5 + $0x8] sm:$0xff]   ;;  %v1500_v39 = vld [vmem:[%s2002_s5 + $0x10] sm:$0xff]   ;;  %v1501_v40 = vld [vmem:[%s2002_s5 + $0x18] sm:$0xff]  }
 0x3fc   : > { %1413 = vmatprep.mubr.msk.bf16.mxu1 %vm1619_vm0, %v1618_v1  ;;  %1410 = vmatpush3.bf16.msra.mxu1 %v1494_v47 }
 0x3fd   : > { %v671_v42 = vpack.c.bf16 %v663_v41, %v663_v41  ;;  %667 = vst.msk [vmem:[%s1833_s25 + $0x18] sm:$0xff] %vm415_vm2, %v663_v41  ;;  %1411 = vmatprep.subr.bf16.mxu1 %v1618_v1  ;;  %v981_v41 = vsub.s32 4, %v1755_v6 }
 0x3ff   : > { %1406 = vmatmul.mubr.msk.bf16.vlgmr.msra.gmra.mrb[16].mxu0 %vm415_vm2, %v671_v42  ;;  %v982_v42 = vrot.slane %v1761_v8, %v981_v41 }
 0x400   : > { %1421 = vmatprep.mubr.msk.bf16.mxu0 %vm1619_vm0, %v1618_v1  ;;  %1412 = vmatpush3.bf16.msra.mxu1 %v1495_v48 }
 0x401   : > { %1425 = vmatprep.subr.bf16.mxu1 %v1618_v1  ;;  %1418 = vmatpush3.bf16.msra.mxu0 %v1496_v19 }
 0x402   : > { %1419 = vmatprep.subr.bf16.mxu0 %v1618_v1 }
 0x465   : > { %v715_v43 = vpop.f32.mrb[8].mxu1 }
 0x466   : > { %v1389_v44 = vpop.f32.mrb[9].mxu1 }
 0x467   : > { %v718_v45 = vpop.f32.mrb[10].mxu1 }
 0x468   : > { %v1390_v46 = vpop.f32.mrb[11].mxu1 }
 0x4ca   : > { %v763_v49 = vpop.f32.mrb[12].mxu0 }
 0x4cb   : > { %866 = vrot.lane.b32.xlu1 %v763_v49, %s1625_s17  ;;  %v1395_v50 = vpop.f32.mrb[13].mxu0 }
 0x4cc   : > { %v766_v51 = vpop.f32.mrb[14].mxu0 }
 0x4cd   : > { %v1396_v52 = vpop.f32.mrb[15].mxu0 }
 0x4ce   : > { %v811_v53 = vpop.f32.mrb[12].mxu1 }
 0x4cf   : > { %870 = vrot.lane.b32.xlu0 %v811_v53, %s1626_s18  ;;  %v1401_v54 = vpop.f32.mrb[13].mxu1  ;;  %s1522_s18 = scalar_lea.vmem %s1912_s21, 512 }
 0x4d0   : > { %v814_v55 = vpop.f32.mrb[14].mxu1  ;;  %p1523_p11 = scmp.ne.s32.totalorder %s1912_s21, %s1522_s18 }
 0x4d1   : > { %v1402_v56 = vpop.f32.mrb[15].mxu1 }
 0x4d2   : > { %v859_v57 = vpop.f32.mrb[16].mxu0  ;;  %p1524_p12 = pnand %p1523_p11, %p1714_p5 }
 0x4d3   : > { %874 = vrot.lane.b32.xlu1 %v859_v57, %s1627_s19  ;;  %v1407_v58 = vpop.f32.mrb[17].mxu0  ;;  %s1628_s19 = smov [#allocation4]  }
 0x4d4   : > { %v862_v59 = vpop.f32.mrb[18].mxu0  ;;  %p1525_p13 = pneg %p1524_p12  ;;  %s1526_s20 = sshll.u32 %s1628_s19, 4  ;;  %s1527_s20 = int_to_ptr.vmem [resolvable:$false] %s1526_s20 }
 0x4d5   : > { %v1408_v60 = vpop.f32.mrb[19].mxu0  ;;  %s1528_s25 = scalar_lea.vmem %s1527_s20, 1024  ;;  %p1529_p0 = scmp.lt.s32.totalorder %s1912_s21, %s1527_s20 }
 0x4d6   : > { %p1530_p1 = scmp.lt.s32.totalorder %s1528_s25, %s1522_s18 }
 0x4d8   : > { %p1531_p2 = por %p1530_p1, %p1529_p0 }
 0x4da   : > { %p1532_p3 = pnand %p1531_p2, %p1525_p13 }
 0x53d   : > { %v867_v61 = vpop.permute.xlu1 %866 }
 0x53e   : > { %v877_v63 = vsel %vm415_vm2, %v715_v43, %v867_v61 }
 0x541   : > { %v871_v62 = vpop.permute.xlu0 %870 }
 0x542   : > { %v879_v0 = vsel %vm878_vm5, %v877_v63, %v871_v62 }
 0x545   : > { %v875_v2 = vpop.permute.xlu1 %874 }
 0x546   : > { %v881_v4 = vsel %vm880_vm6, %v879_v0, %v875_v2 }
 0x547   : > { %v882_v5 = vpack.c.bf16 %v881_v4, %v881_v4 }
 0x549   : > { %1414 = vmatmul.mubr.msk.bf16.vlgmr.msra.gmra.mrb[16].mxu1 %vm354_vm1, %v882_v5 }
 0x54a   : > { %1433 = vmatprep.mubr.msk.bf16.mxu1 %vm1619_vm0, %v1618_v1  ;;  %1426 = vmatpush3.bf16.msra.mxu1 %v1498_v20 }
 0x54b   : > { %1427 = vmatprep.subr.bf16.mxu1 %v1618_v1 }
 0x54e   : > { %1428 = vmatpush3.bf16.msra.mxu1 %v1499_v23 }
 0x54f   : > { %1429 = vmatprep.subr.bf16.mxu1 %v1618_v1 }
 0x552   : > { %1430 = vmatpush3.bf16.msra.mxu1 %v1500_v39 }
 0x553   : > { %1431 = vmatprep.subr.bf16.mxu1 %v1618_v1  ;;  %v1050_v1 = vsub.s32 5, %v1755_v6 }
 0x555   : > { %v1051_v50 = vrot.slane %v1761_v8, %v1050_v1 }
 0x556   : > { %1432 = vmatpush3.bf16.msra.mxu1 %v1501_v40 }
 0x61c   : > { %v936_v10 = vpop.f32.mrb[16].mxu1 }
 0x61d   : > { %v942_v11 = vadd.f32 %v936_v10, %v1748_v3  ;;  %v1415_v12 = vpop.f32.mrb[17].mxu1  ;;  %v1497_v3 = vld [vmem:[%s2001_s4 + $0x8] sm:$0xff]  }
 0x61e   : > { %v939_v13 = vpop.f32.mrb[18].mxu1  ;;  %1420 = vmatpush3.bf16.msra.mxu0 %v1497_v3 }
 0x61f   : > { %v947_v14 = vadd.f32 %v946_v9, %v942_v11  ;;  %v1416_v15 = vpop.f32.mrb[19].mxu1 }
 0x621   : > { %v948_v16 = vsel %vm354_vm1, %v947_v14, 0.0  ;;  %v953_v17 = vmul.f32 %v947_v14, %v947_v14 }
 0x622   : > { %949 = vadd.xlane.f32.xlu0 %v948_v16 }
 0x623   : > { %v954_v18 = vsel %vm354_vm1, %v953_v17, 0.0 }
 0x624   : > { %955 = vadd.xlane.f32.xlu1 %v954_v18 }
 0x6af   : > { %v950_v24 = vpop.xlane.xlu0 %949 }
 0x6b0   : > { %v952_v25 = vmul.f32 0.03125, %v950_v24 }
 0x6b1   : > { %v956_v26 = vpop.xlane.xlu1 %955 }
 0x6b2   : > { %v958_v27 = vmul.f32 %v952_v25, %v952_v25  ;;  %v957_v28 = vmul.f32 0.03125, %v956_v26  ;;  %v960_v31 = vsub.f32 %v947_v14, %v952_v25 }
 0x6b4   : > { %v959_v21 = vsub.f32 %v957_v28, %v958_v27 }
 0x6b6   : > { %v961_v22 = vadd.f32 1e-05, %v959_v21 }
 0x6b8   : > { %1518 = vrsqrt.f32 %v961_v22 }
 0x6c2   : > { %v1519_v33 = vpop.eup %1518 }
 0x6c3   : > { %v963_v34 = vmul.f32 %v1519_v33, %v960_v31 }
 0x6c5   : > { %v968_v36 = vmul.f32 %v967_v32, %v963_v34 }
 0x6c7   : > { %v973_v37 = vadd.f32 %v972_v35, %v968_v36 }
 0x6c9   : > { %v974_v38 = vpack.c.bf16 %v973_v37, %v973_v37 }
 0x6cb   : > { %1422 = vmatmul.mubr.msk.bf16.vlgmr.msra.gmra.mrb[20].mxu0 %vm354_vm1, %v974_v38 }
 0x79e   : > { %v1032_v43 = vpop.f32.mrb[20].mxu0 }
 0x79f   : > { %v1033_v44 = vadd.f32 %v1032_v43, %v982_v42  ;;  %v1423_v45 = vpop.f32.mrb[21].mxu0 }
 0x7a0   : > { %v1035_v46 = vpop.f32.mrb[22].mxu0 }
 0x7a1   : > { %v1038_v47 = vmax.f32 %v1033_v44, 0.0  ;;  %v1424_v48 = vpop.f32.mrb[23].mxu0 }
 0x7a3   : > { %v1039_v49 = vpack.c.bf16 %v1038_v47, %v1038_v47 }
 0x7a5   : > { %1434 = vmatmul.mubr.msk.bf16.vlgmr.msra.gmra.mrb[20].mxu1 %vm1076_vm7, %v1039_v49 }
 0x878   : > { %v1114_v51 = vpop.f32.mrb[20].mxu1 }
 0x879   : > { %v1115_v52 = vadd.f32 %v1114_v51, %v1051_v50  ;;  %v1435_v53 = vpop.f32.mrb[21].mxu1 }
 0x87a   : > { %v1117_v54 = vpop.f32.mrb[22].mxu1 }
 0x87b   : > { %v1120_v55 = vadd.f32 %v1115_v52, %v973_v37  ;;  %v1436_v56 = vpop.f32.mrb[23].mxu1 }
 0x87d   : > { %v1121_v57 = vsel %vm354_vm1, %v1120_v55, 0.0  ;;  %v1125_v58 = vmul.f32 %v1120_v55, %v1120_v55 }
 0x87e   : > { %1122 = vadd.xlane.f32.xlu0 %v1121_v57 }
 0x87f   : > { %v1126_v59 = vsel %vm354_vm1, %v1125_v58, 0.0 }
 0x882   : > { %1127 = vadd.xlane.f32.xlu0 %v1126_v59 }
 0x883   : > { %1535 = shalt.err (!%p1532_p3)
}
 0x884   : > { %s1536_s23 = scalar_lea.hbm %s1917_s12, 512  ;;  %s1540_s10 = scalar_lea.hbm %s2005_s8, 1024 }
 0x885   : > { %p1537_p4 = scmp.ne.s32.totalorder %s1917_s12, %s1536_s23  ;;  %p1541_p9 = scmp.lt.u32.totalorder %s1917_s12, %s2005_s8 }
 0x886   : > { %p1542_p10 = scmp.lt.u32.totalorder %s1540_s10, %s1536_s23  ;;  %p1544_p12 = scmp.lt.u32.totalorder %s1536_s23, %s1917_s12 }
 0x887   : > { %p1538_p7 = pnand %p1537_p4, %p1714_p5 }
 0x888   : > { %p1543_p11 = por %p1542_p10, %p1541_p9 }
 0x889   : > { %p1539_p8 = pneg %p1538_p7 }
 0x88a   : > { %p1545_p13 = por %p1544_p12, %p1543_p11 }
 0x88c   : > { %p1546_p0 = pnand %p1545_p13, %p1539_p8 }
 0x88e   : > { %1549 = shalt.err (!%p1546_p0)
}
 0x88f   : > { %s1629_s18 = smov 128   ;;  %v1138_v5 = vsub.s32 6, %v1755_v6  ;;  %s1289_s25 = sshll.u32 %s1830_s22, 3  ;;  %v1143_v7 = vsub.s32 7, %v1755_v6 }
 0x890   : > { %1438 = dma.vmem_to_hbm [thread:$0]  (%p1714_p5), %s1912_s21, 512, %s1917_s12, %s1153_s13, %s1629_s18, %s1629_s18, %s1625_s17  }
 0x891   : > { %v1139_v10 = vrot.slane %v1761_v8, %v1138_v5  ;;  %v1144_v13 = vrot.slane %v1761_v8, %v1143_v7  ;;  %s1317_s17 = sshll.u32 %s1697_s9, 7  ;;  %s313_s21 = scalar_lea.vmem [#allocation2], %s1289_s25 }
 0x892   : > { %s1166_s12 = sshll.u32 %s313_s21, 4  ;;  %s1953_s24 = scalar_lea.hbm %s2004_s7, %s1317_s17  ;;  %s1955_s12 = int_to_ptr.vmem [resolvable:$true] %s1166_s12 }
 0x893   : > { %s1148_s26 = scalar_lea.sflag [#allocation3], %s1830_s22  ;;  %s1550_s10 = scalar_lea.vmem %s1955_s12, 128 }
 0x894   : > { %p1551_p1 = scmp.ne.s32.totalorder %s1955_s12, %s1550_s10  ;;  %s1630_s9 = smov [#allocation2]  }
 0x895   : > { %s1554_s19 = sshll.u32 %s1630_s9, 4  ;;  %s1555_s19 = int_to_ptr.vmem [resolvable:$false] %s1554_s19 }
 0x896   : > { %p1552_p2 = pnand %p1551_p1, %p1714_p5  ;;  %s1556_s20 = scalar_lea.vmem %s1555_s19, 256 }
 0x897   : > { %p1557_p4 = scmp.lt.s32.totalorder %s1955_s12, %s1555_s19  ;;  %p1558_p7 = scmp.lt.s32.totalorder %s1556_s20, %s1550_s10 }
 0x898   : > { %p1553_p3 = pneg %p1552_p2 }
 0x899   : > { %p1559_p8 = por %p1558_p7, %p1557_p4 }
 0x89b   : > { %p1560_p9 = pnand %p1559_p8, %p1553_p3 }
 0x90b   : > { %v1123_v60 = vpop.xlane.xlu0 %1122 }
 0x90c   : > { %v1124_v61 = vmul.f32 0.03125, %v1123_v60 }
 0x90e   : > { %v1130_v63 = vmul.f32 %v1124_v61, %v1124_v61  ;;  %v1132_v9 = vsub.f32 %v1120_v55, %v1124_v61 }
 0x90f   : > { %v1128_v62 = vpop.xlane.xlu0 %1127 }
 0x910   : > { %v1129_v0 = vmul.f32 0.03125, %v1128_v62 }
 0x912   : > { %v1131_v2 = vsub.f32 %v1129_v0, %v1130_v63 }
 0x914   : > { %v1133_v4 = vadd.f32 1e-05, %v1131_v2 }
 0x916   : > { %1520 = vrsqrt.f32 %v1133_v4 }
 0x920   : > { %v1521_v11 = vpop.eup %1520 }
 0x921   : > { %v1135_v12 = vmul.f32 %v1521_v11, %v1132_v9 }
 0x923   : > { %v1140_v14 = vmul.f32 %v1139_v10, %v1135_v12 }
 0x925   : > { %v1145_v15 = vadd.f32 %v1144_v13, %v1140_v14 }
 0x927   : > { %1146 = vst.msk [vmem:[%s313_s21] sm:$0xff] %vm354_vm1, %v1145_v15 }
 0x928   : > { %1563 = shalt.err (!%p1560_p9)
}
 0x929   : > { %s1564_s22 = scalar_lea.hbm %s1953_s24, 128  ;;  %s1568_s17 = scalar_lea.hbm %s2004_s7, 256 }
 0x92a   : > { %p1565_p10 = scmp.ne.s32.totalorder %s1953_s24, %s1564_s22  ;;  %p1569_p13 = scmp.lt.u32.totalorder %s1953_s24, %s2004_s7 }
 0x92b   : > { %p1570_p0 = scmp.lt.u32.totalorder %s1568_s17, %s1564_s22  ;;  %p1572_p2 = scmp.lt.u32.totalorder %s1564_s22, %s1953_s24 }
 0x92c   : > { %p1566_p11 = pnand %p1565_p10, %p1714_p5 }
 0x92d   : > { %p1571_p1 = por %p1570_p0, %p1569_p13 }
 0x92e   : > { %p1567_p12 = pneg %p1566_p11 }
 0x92f   : > { %p1573_p3 = por %p1572_p2, %p1571_p1 }
 0x931   : > { %p1574_p4 = pnand %p1573_p3, %p1567_p12 }
 0x933   : > { %1577 = shalt.err (!%p1574_p4)
}
 0x934   : > { %1437 = dma.vmem_to_hbm [thread:$0]  (%p1714_p5), %s1955_s12, 128, %s1953_s24, %s1148_s26  }
 0x935 PF: > { %p1448_p7 = scmp.ge.s32.totalorder %s1616_s30, 2  ;;  %s1194_s23 = sand.u32 1, %s1604_s27  }
 0x936   : > { %s1195_s10 = scalar_lea.sflag [#allocation3], %s1194_s23 }
 0x937   : > { %p1442_p8 = pnand %p1448_p7, %p1718_p6 }
 0x939   : > { %1595 = dma.done.wait (!%p1442_p8), %s1195_s10, 128  }
 0x93a   : > { %1597 = vsyncadd (!%p1442_p8), %s1195_s10, 4294967168  ;;  %s1204_s9 = scalar_lea.sflag [#allocation5], %s1194_s23 }
 0x93b   : > { %1599 = dma.done.wait (!%p1442_p8), %s1204_s9, 512  }
 0x93c   : > { %1601 = vsyncadd (!%p1442_p8), %s1204_s9, 4294966784  ;;  %p22_p5 = scmp.ge.s32.totalorder %s1701_s11, 4   ;;  %s2008_s27 = smov %s1608_s28 }
 0x93d   : > { %s2009_s28 = smov %s1612_s29  ;;  %s2010_s29 = smov %s1712_s14 }
 0x93e   : > { %s2011_s30 = smov %s1701_s11  ;;  %24 = sbr.rel (!%p22_p5) target bundleno = 5 (0x5), region = 103 }
 0x945   :  { %1209 = vsyncpa [#allocation3], 1 }
 0x946   :  { %1211 = vsyncpa [#allocation3 + $0x1], 1 }
 0x947   :  { %1212 = vsyncpa [#allocation5], 1 }
 0x948   :  { %1214 = vsyncpa [#allocation5 + $0x1], 1 }

</bundles_post_ra>
